<compile_context>
chip_gen: v6e
topology: v6e:2x2x1
jax: 0.10.0
libtpu: 0.0.40
codegen_flags: <defaults>
</compile_context>

<pallas_src>
import math

import jax
import jax.numpy as jnp
from jax.experimental import pallas as pl

# ----------------------------- model dims (small) -----------------------------
VOCAB = 64
HIDDEN = 32
N_HEADS = 2
HEAD_DIM = HIDDEN // N_HEADS
INTERMEDIATE = 64
N_LAYERS = 2
NUM_LABELS = 5          # ['Very Negative', 'Negative', 'Neutral', 'Positive', 'Very Positive']
BATCH = 2
SEQ = 8
BS = BATCH * SEQ
LN_EPS = 1e-7
BN_EPS = 1e-5
LOGITS_PAD = 128        # lane-dense output width (final logits slab)

# data slab layout (one [BS, 128] f32 input)
DATA_LANES = 128
IDS_LANE = 0            # lane 0: token id (as f32) per row
TMASK_LANE = 1          # lane 1: token mask per row (embedding mask multiply)
ABIAS_LANE = 32         # lanes 32..32+BS-1: additive attention bias [BS, BS]


# ----------------------------- parameter slab layout --------------------------
def _param_layout():
    entries = []

    def add(name, rows, cols):
        entries.append((name, rows, cols))

    add("word_emb", VOCAB, HIDDEN)
    add("emb_g", 1, HIDDEN)
    add("emb_b", 1, HIDDEN)
    for li in range(N_LAYERS):
        p = f"l{li}_"
        add(p + "wqkv", HIDDEN, 3 * HIDDEN)
        add(p + "bqkv", 1, 3 * HIDDEN)
        add(p + "wo", HIDDEN, HIDDEN)
        add(p + "bo", 1, HIDDEN)
        add(p + "ln1_g", 1, HIDDEN)
        add(p + "ln1_b", 1, HIDDEN)
        add(p + "wi", HIDDEN, INTERMEDIATE)
        add(p + "bi", 1, INTERMEDIATE)
        add(p + "wf", INTERMEDIATE, HIDDEN)
        add(p + "bf", 1, HIDDEN)
        add(p + "ln2_g", 1, HIDDEN)
        add(p + "ln2_b", 1, HIDDEN)
    Hh = HIDDEN // 2
    add("wp", HIDDEN, HIDDEN)
    add("bp", 1, HIDDEN)
    add("w1", HIDDEN, Hh)
    add("b1", 1, Hh)
    add("bn_g", 1, Hh)
    add("bn_b", 1, Hh)
    add("bn_m", 1, Hh)
    add("bn_v", 1, Hh)
    add("w2p", Hh, LOGITS_PAD)
    add("b2p", 1, LOGITS_PAD)

    layout = {}
    off = 0
    for name, rows, cols in entries:
        layout[name] = (off, rows, cols)
        off += -(-rows // 8) * 8        # 8-aligned (sublane) start for every param
    return layout, off


PARAM_LAYOUT, PARAM_ROWS = _param_layout()


# ----------------------------- fused forward kernel ---------------------------
def _ln(x, g, b, eps=LN_EPS):
    mu = jnp.mean(x, axis=-1, keepdims=True)
    var = jnp.mean((x - mu) ** 2, axis=-1, keepdims=True)
    return (x - mu) * jax.lax.rsqrt(var + eps) * g + b


def _fused_forward_kernel(data_ref, p_ref, o_ref):
    def rd(name):
        off, r, c = PARAM_LAYOUT[name]
        return p_ref[off:off + r, 0:c]

    # ---- embeddings: in-kernel one-hot gather from the VMEM-resident vocab table ----
    ids = data_ref[:, IDS_LANE:IDS_LANE + 1].astype(jnp.int32)            # [BS, 1]
    vocab_iota = jax.lax.broadcasted_iota(jnp.int32, (BS, VOCAB), 1)
    onehot = (ids == vocab_iota).astype(jnp.float32)                      # [BS, VOCAB]
    x = jnp.dot(onehot, rd("word_emb"), preferred_element_type=jnp.float32)
    x = _ln(x, rd("emb_g"), rd("emb_b"))
    x = x * data_ref[:, TMASK_LANE:TMASK_LANE + 1]                        # HF embeddings mask

    # block-diagonal (per-sequence) + key-padding additive bias, precomputed in the wrapper
    attn_bias = data_ref[:, ABIAS_LANE:ABIAS_LANE + BS]                   # [BS, BS]

    # ---- encoder layers (fully unrolled; everything stays in VMEM/vregs) ----
    for li in range(N_LAYERS):
        pre = f"l{li}_"
        qkv = jnp.dot(x, rd(pre + "wqkv"),
                      preferred_element_type=jnp.float32) + rd(pre + "bqkv")   # [BS, 3H]
        # 1/sqrt(HEAD_DIM) is already folded into the Q columns of wqkv.
        ctx_heads = []
        for h in range(N_HEADS):
            c0 = h * HEAD_DIM
            q_h = qkv[:, c0:c0 + HEAD_DIM]                                 # [BS, Dh]
            k_h = qkv[:, HIDDEN + c0:HIDDEN + c0 + HEAD_DIM]
            v_h = qkv[:, 2 * HIDDEN + c0:2 * HIDDEN + c0 + HEAD_DIM]
            # q @ k^T without an explicit transpose (contract last dims of both)
            s = jax.lax.dot_general(q_h, k_h, (((1,), (1,)), ((), ())),
                                    preferred_element_type=jnp.float32)    # [BS, BS]
            s = s + attn_bias
            s = s - jnp.max(s, axis=-1, keepdims=True)
            pexp = jnp.exp(s)
            pexp = pexp * pl.reciprocal(jnp.sum(pexp, axis=-1, keepdims=True),
                                        approx=True)
            ctx_heads.append(jnp.dot(pexp, v_h,
                                     preferred_element_type=jnp.float32))  # [BS, Dh]
        ctx = jnp.concatenate(ctx_heads, axis=1)                           # [BS, H], in vregs

        attn_out = jnp.dot(ctx, rd(pre + "wo"),
                           preferred_element_type=jnp.float32) + rd(pre + "bo")
        x = _ln(attn_out + x, rd(pre + "ln1_g"), rd(pre + "ln1_b"))
        ffh = jax.nn.gelu(jnp.dot(x, rd(pre + "wi"),
                                  preferred_element_type=jnp.float32) + rd(pre + "bi"))
        ff = jnp.dot(ffh, rd(pre + "wf"),
                     preferred_element_type=jnp.float32) + rd(pre + "bf")
        x = _ln(ff + x, rd(pre + "ln2_g"), rd(pre + "ln2_b"))

    # ---- ContextPooler: token 0 of each sequence via static row slices ----
    pooled = jnp.concatenate([x[b * SEQ:b * SEQ + 1, :] for b in range(BATCH)],
                             axis=0)                                       # [B, H]
    ph = jax.nn.gelu(jnp.dot(pooled, rd("wp"),
                             preferred_element_type=jnp.float32) + rd("bp"))

    # ---- custom classifier head (eval semantics: dropout = identity, BN = running stats) ----
    h1 = jnp.dot(ph, rd("w1"), preferred_element_type=jnp.float32) + rd("b1")
    h1 = (h1 - rd("bn_m")) * jax.lax.rsqrt(rd("bn_v") + BN_EPS) * rd("bn_g") + rd("bn_b")
    h1 = jnp.maximum(h1, 0.0)
    logits = jnp.dot(h1, rd("w2p"), preferred_element_type=jnp.float32) + rd("b2p")  # [B, 128]
    # outer self.dropout(outputs.logits) is identity in eval mode
    o_ref[...] = logits.astype(o_ref.dtype)


def fused_forward(data, param_slab):
    return pl.pallas_call(
        _fused_forward_kernel,
        out_shape=jax.ShapeDtypeStruct((BATCH, LOGITS_PAD), jnp.float32),
        in_specs=[pl.BlockSpec(data.shape, lambda: (0, 0)),
                  pl.BlockSpec(param_slab.shape, lambda: (0, 0))],
        out_specs=pl.BlockSpec((BATCH, LOGITS_PAD), lambda: (0, 0)),
    )(data, param_slab)


# ----------------------------- parameters -------------------------------------
def init_params(key):
    def nrm(k, shape, scale=0.02):
        return scale * jax.random.normal(k, shape, dtype=jnp.float32)

    keys = jax.random.split(key, N_LAYERS + 2)
    p = {}
    p["word_emb"] = nrm(keys[0], (VOCAB, HIDDEN))
    p["emb_g"] = jnp.ones((1, HIDDEN), jnp.float32)
    p["emb_b"] = jnp.zeros((1, HIDDEN), jnp.float32)

    attn_scale = 1.0 / math.sqrt(HEAD_DIM)
    for li in range(N_LAYERS):
        lk = jax.random.split(keys[1 + li], 6)
        pre = f"l{li}_"
        wq = nrm(lk[0], (HIDDEN, HIDDEN))
        wk = nrm(lk[1], (HIDDEN, HIDDEN))
        wv = nrm(lk[2], (HIDDEN, HIDDEN))
        # fused QKV with 1/sqrt(Dh) folded into the Q columns (bias is zero)
        p[pre + "wqkv"] = jnp.concatenate([wq * attn_scale, wk, wv], axis=1)
        p[pre + "bqkv"] = jnp.zeros((1, 3 * HIDDEN), jnp.float32)
        p[pre + "wo"] = nrm(lk[3], (HIDDEN, HIDDEN))
        p[pre + "bo"] = jnp.zeros((1, HIDDEN), jnp.float32)
        p[pre + "ln1_g"] = jnp.ones((1, HIDDEN), jnp.float32)
        p[pre + "ln1_b"] = jnp.zeros((1, HIDDEN), jnp.float32)
        p[pre + "wi"] = nrm(lk[4], (HIDDEN, INTERMEDIATE))
        p[pre + "bi"] = jnp.zeros((1, INTERMEDIATE), jnp.float32)
        p[pre + "wf"] = nrm(lk[5], (INTERMEDIATE, HIDDEN))
        p[pre + "bf"] = jnp.zeros((1, HIDDEN), jnp.float32)
        p[pre + "ln2_g"] = jnp.ones((1, HIDDEN), jnp.float32)
        p[pre + "ln2_b"] = jnp.zeros((1, HIDDEN), jnp.float32)

    hk = jax.random.split(keys[-1], 3)
    Hh = HIDDEN // 2
    p["wp"] = nrm(hk[0], (HIDDEN, HIDDEN))
    p["bp"] = jnp.zeros((1, HIDDEN), jnp.float32)
    p["w1"] = nrm(hk[1], (HIDDEN, Hh))
    p["b1"] = jnp.zeros((1, Hh), jnp.float32)
    p["bn_g"] = jnp.ones((1, Hh), jnp.float32)
    p["bn_b"] = jnp.zeros((1, Hh), jnp.float32)
    p["bn_m"] = jnp.zeros((1, Hh), jnp.float32)
    p["bn_v"] = jnp.ones((1, Hh), jnp.float32)
    w2 = nrm(hk[2], (Hh, NUM_LABELS))
    p["w2p"] = jnp.zeros((Hh, LOGITS_PAD), jnp.float32).at[:, :NUM_LABELS].set(w2)
    p["b2p"] = jnp.zeros((1, LOGITS_PAD), jnp.float32)
    return p


def pack_params(params):
    """Pack every parameter into one lane-dense [PARAM_ROWS, 128] f32 slab."""
    assert set(params.keys()) == set(PARAM_LAYOUT.keys())
    slab = jnp.zeros((PARAM_ROWS, DATA_LANES), jnp.float32)
    for name, (off, r, c) in PARAM_LAYOUT.items():
        arr = params[name].reshape(r, c).astype(jnp.float32)
        slab = slab.at[off:off + r, 0:c].set(arr)
    return slab


# ----------------------------- forward pass -----------------------------------
def deberta_forward(param_slab, input_ids, attention_mask):
    ids_f = input_ids.reshape(BS).astype(jnp.float32)
    tok_f = attention_mask.reshape(BS).astype(jnp.float32)

    # additive attention bias: block-diagonal per sequence + key padding mask
    pos = jnp.arange(BS) // SEQ
    same = (pos[:, None] == pos[None, :]).astype(jnp.float32)            # [BS, BS]
    keep = same * tok_f[None, :]
    bias = (1.0 - keep) * (-1e9)

    data = jnp.zeros((BS, DATA_LANES), jnp.float32)
    data = data.at[:, IDS_LANE].set(ids_f)
    data = data.at[:, TMASK_LANE].set(tok_f)
    data = data.at[:, ABIAS_LANE:ABIAS_LANE + BS].set(bias)

    logits_pad = fused_forward(data, param_slab)                         # [B, 128]
    return {"logits": logits_pad[:, :NUM_LABELS]}                        # labels=None path


# ----------------------------- main --------------------------------------------
if __name__ == "__main__":
    key = jax.random.PRNGKey(0)
    pkey, ikey = jax.random.split(key)
    params = init_params(pkey)
    param_slab = pack_params(params)

    input_ids = jax.random.randint(ikey, (BATCH, SEQ), 0, VOCAB, dtype=jnp.int32)
    attention_mask = jnp.ones((BATCH, SEQ), dtype=jnp.int32)
    attention_mask = attention_mask.at[1, SEQ - 2:].set(0)               # some padding

    fwd = jax.jit(deberta_forward)
    out = fwd(param_slab, input_ids, attention_mask)
    logits = jax.block_until_ready(out["logits"])
    assert logits.shape == (BATCH, NUM_LABELS)
    assert bool(jnp.all(jnp.isfinite(logits)))
    print("KERNEL_OK")
</pallas_src>

<mosaic_0001>
module attributes {stable_mosaic.version = 11 : i64} {
  func.func @_fused_forward_kernel(%arg0: memref<16x128xf32, #tpu.memory_space<vmem>>, %arg1: memref<664x128xf32, #tpu.memory_space<vmem>>, %arg2: memref<2x128xf32, #tpu.memory_space<vmem>>) attributes {dimension_semantics = [], scalar_prefetch = 0 : i64, scratch_operands = 0 : i64, tpu.core_type = #tpu.core_type<tc>} {
    %c0 = arith.constant 0 : index
    %c0_0 = arith.constant 0 : index
    %0 = vector.load %arg0[%c0, %c0_0] : memref<16x128xf32, #tpu.memory_space<vmem>>, vector<16x1xf32>
    %1 = arith.fptosi %0 : vector<16x1xf32> to vector<16x1xi32>
    %2 = tpu.iota {dimensions = array<i32: 1>} : vector<16x64xi32>
    %3 = vector.broadcast %1 : vector<16x1xi32> to vector<16x64xi32>
    %4 = arith.cmpi eq, %3, %2 : vector<16x64xi32>
    %5 = arith.extui %4 : vector<16x64xi1> to vector<16x64xi32>
    %6 = arith.sitofp %5 : vector<16x64xi32> to vector<16x64xf32>
    %c0_1 = arith.constant 0 : index
    %c0_2 = arith.constant 0 : index
    %7 = vector.load %arg1[%c0_1, %c0_2] : memref<664x128xf32, #tpu.memory_space<vmem>>, vector<64x32xf32>
    %cst = arith.constant dense<0.000000e+00> : vector<16x32xf32>
    %8 = tpu.matmul %6, %7, %cst {dimension_numbers = #tpu.dot_dimension_numbers<[1], [0], [0], [1], [0, 0, 1, 1], [], []>} : vector<16x64xf32>, vector<64x32xf32>, vector<16x32xf32> -> vector<16x32xf32>
    %c64 = arith.constant 64 : index
    %c0_3 = arith.constant 0 : index
    %9 = vector.load %arg1[%c64, %c0_3] : memref<664x128xf32, #tpu.memory_space<vmem>>, vector<1x32xf32>
    %c72 = arith.constant 72 : index
    %c0_4 = arith.constant 0 : index
    %10 = vector.load %arg1[%c72, %c0_4] : memref<664x128xf32, #tpu.memory_space<vmem>>, vector<1x32xf32>
    %cst_5 = arith.constant dense<0.000000e+00> : vector<16xf32>
    %11 = vector.multi_reduction <add>, %8, %cst_5 [1] : vector<16x32xf32> to vector<16xf32>
    %12 = vector.shape_cast %11 : vector<16xf32> to vector<16x1xf32>
    %cst_6 = arith.constant 3.200000e+01 : f32
    %13 = vector.broadcast %cst_6 : f32 to vector<16x1xf32>
    %14 = arith.divf %12, %13 : vector<16x1xf32>
    %15 = vector.broadcast %14 : vector<16x1xf32> to vector<16x32xf32>
    %16 = arith.subf %8, %15 : vector<16x32xf32>
    %17 = arith.mulf %16, %16 : vector<16x32xf32>
    %cst_7 = arith.constant dense<0.000000e+00> : vector<16xf32>
    %18 = vector.multi_reduction <add>, %17, %cst_7 [1] : vector<16x32xf32> to vector<16xf32>
    %19 = vector.shape_cast %18 : vector<16xf32> to vector<16x1xf32>
    %cst_8 = arith.constant 3.200000e+01 : f32
    %20 = vector.broadcast %cst_8 : f32 to vector<16x1xf32>
    %21 = arith.divf %19, %20 : vector<16x1xf32>
    %22 = vector.broadcast %14 : vector<16x1xf32> to vector<16x32xf32>
    %23 = arith.subf %8, %22 : vector<16x32xf32>
    %cst_9 = arith.constant 1.000000e-07 : f32
    %24 = vector.broadcast %cst_9 : f32 to vector<16x1xf32>
    %25 = arith.addf %21, %24 : vector<16x1xf32>
    %26 = math.rsqrt %25 : vector<16x1xf32>
    %27 = vector.broadcast %26 : vector<16x1xf32> to vector<16x32xf32>
    %28 = arith.mulf %23, %27 : vector<16x32xf32>
    %29 = vector.broadcast %9 : vector<1x32xf32> to vector<16x32xf32>
    %30 = arith.mulf %28, %29 : vector<16x32xf32>
    %31 = vector.broadcast %10 : vector<1x32xf32> to vector<16x32xf32>
    %32 = arith.addf %30, %31 : vector<16x32xf32>
    %c0_10 = arith.constant 0 : index
    %c1 = arith.constant 1 : index
    %33 = vector.load %arg0[%c0_10, %c1] : memref<16x128xf32, #tpu.memory_space<vmem>>, vector<16x1xf32>
    %34 = vector.broadcast %33 : vector<16x1xf32> to vector<16x32xf32>
    %35 = arith.mulf %32, %34 : vector<16x32xf32>
    %c0_11 = arith.constant 0 : index
    %c32 = arith.constant 32 : index
    %36 = vector.load %arg0[%c0_11, %c32] : memref<16x128xf32, #tpu.memory_space<vmem>>, vector<16x16xf32>
    %c80 = arith.constant 80 : index
    %c0_12 = arith.constant 0 : index
    %37 = vector.load %arg1[%c80, %c0_12] : memref<664x128xf32, #tpu.memory_space<vmem>>, vector<32x96xf32>
    %cst_13 = arith.constant dense<0.000000e+00> : vector<16x96xf32>
    %38 = tpu.matmul %35, %37, %cst_13 {dimension_numbers = #tpu.dot_dimension_numbers<[1], [0], [0], [1], [0, 0, 1, 1], [], []>} : vector<16x32xf32>, vector<32x96xf32>, vector<16x96xf32> -> vector<16x96xf32>
    %c112 = arith.constant 112 : index
    %c0_14 = arith.constant 0 : index
    %39 = vector.load %arg1[%c112, %c0_14] : memref<664x128xf32, #tpu.memory_space<vmem>>, vector<1x96xf32>
    %40 = vector.broadcast %39 : vector<1x96xf32> to vector<16x96xf32>
    %41 = arith.addf %38, %40 : vector<16x96xf32>
    %42 = vector.extract_strided_slice %41 {offsets = [0, 0], sizes = [16, 16], strides = [1, 1]} : vector<16x96xf32> to vector<16x16xf32>
    %43 = vector.extract_strided_slice %41 {offsets = [0, 32], sizes = [16, 16], strides = [1, 1]} : vector<16x96xf32> to vector<16x16xf32>
    %44 = vector.extract_strided_slice %41 {offsets = [0, 64], sizes = [16, 16], strides = [1, 1]} : vector<16x96xf32> to vector<16x16xf32>
    %cst_15 = arith.constant dense<0.000000e+00> : vector<16x16xf32>
    %45 = tpu.matmul %42, %43, %cst_15 {dimension_numbers = #tpu.dot_dimension_numbers<[1], [1], [0], [0], [0, 0, 1, 0], [], []>} : vector<16x16xf32>, vector<16x16xf32>, vector<16x16xf32> -> vector<16x16xf32>
    %46 = arith.addf %45, %36 : vector<16x16xf32>
    %cst_16 = arith.constant dense<0xFF800000> : vector<16xf32>
    %47 = vector.multi_reduction <maximumf>, %46, %cst_16 [1] : vector<16x16xf32> to vector<16xf32>
    %48 = vector.shape_cast %47 : vector<16xf32> to vector<16x1xf32>
    %49 = vector.broadcast %48 : vector<16x1xf32> to vector<16x16xf32>
    %50 = arith.subf %46, %49 : vector<16x16xf32>
    %51 = math.exp %50 : vector<16x16xf32>
    %cst_17 = arith.constant dense<0.000000e+00> : vector<16xf32>
    %52 = vector.multi_reduction <add>, %51, %cst_17 [1] : vector<16x16xf32> to vector<16xf32>
    %53 = vector.shape_cast %52 : vector<16xf32> to vector<16x1xf32>
    %54 = tpu.reciprocal %53 {approx = true} : vector<16x1xf32> -> vector<16x1xf32>
    %55 = vector.broadcast %54 : vector<16x1xf32> to vector<16x16xf32>
    %56 = arith.mulf %51, %55 : vector<16x16xf32>
    %cst_18 = arith.constant dense<0.000000e+00> : vector<16x16xf32>
    %57 = tpu.matmul %56, %44, %cst_18 {dimension_numbers = #tpu.dot_dimension_numbers<[1], [0], [0], [1], [0, 0, 1, 1], [], []>} : vector<16x16xf32>, vector<16x16xf32>, vector<16x16xf32> -> vector<16x16xf32>
    %58 = vector.extract_strided_slice %41 {offsets = [0, 16], sizes = [16, 16], strides = [1, 1]} : vector<16x96xf32> to vector<16x16xf32>
    %59 = vector.extract_strided_slice %41 {offsets = [0, 48], sizes = [16, 16], strides = [1, 1]} : vector<16x96xf32> to vector<16x16xf32>
    %60 = vector.extract_strided_slice %41 {offsets = [0, 80], sizes = [16, 16], strides = [1, 1]} : vector<16x96xf32> to vector<16x16xf32>
    %cst_19 = arith.constant dense<0.000000e+00> : vector<16x16xf32>
    %61 = tpu.matmul %58, %59, %cst_19 {dimension_numbers = #tpu.dot_dimension_numbers<[1], [1], [0], [0], [0, 0, 1, 0], [], []>} : vector<16x16xf32>, vector<16x16xf32>, vector<16x16xf32> -> vector<16x16xf32>
    %62 = arith.addf %61, %36 : vector<16x16xf32>
    %cst_20 = arith.constant dense<0xFF800000> : vector<16xf32>
    %63 = vector.multi_reduction <maximumf>, %62, %cst_20 [1] : vector<16x16xf32> to vector<16xf32>
    %64 = vector.shape_cast %63 : vector<16xf32> to vector<16x1xf32>
    %65 = vector.broadcast %64 : vector<16x1xf32> to vector<16x16xf32>
    %66 = arith.subf %62, %65 : vector<16x16xf32>
    %67 = math.exp %66 : vector<16x16xf32>
    %cst_21 = arith.constant dense<0.000000e+00> : vector<16xf32>
    %68 = vector.multi_reduction <add>, %67, %cst_21 [1] : vector<16x16xf32> to vector<16xf32>
    %69 = vector.shape_cast %68 : vector<16xf32> to vector<16x1xf32>
    %70 = tpu.reciprocal %69 {approx = true} : vector<16x1xf32> -> vector<16x1xf32>
    %71 = vector.broadcast %70 : vector<16x1xf32> to vector<16x16xf32>
    %72 = arith.mulf %67, %71 : vector<16x16xf32>
    %cst_22 = arith.constant dense<0.000000e+00> : vector<16x16xf32>
    %73 = tpu.matmul %72, %60, %cst_22 {dimension_numbers = #tpu.dot_dimension_numbers<[1], [0], [0], [1], [0, 0, 1, 1], [], []>} : vector<16x16xf32>, vector<16x16xf32>, vector<16x16xf32> -> vector<16x16xf32>
    %74 = tpu.concatenate %57, %73 in 1 : vector<16x16xf32>, vector<16x16xf32> -> vector<16x32xf32>
    %c120 = arith.constant 120 : index
    %c0_23 = arith.constant 0 : index
    %75 = vector.load %arg1[%c120, %c0_23] : memref<664x128xf32, #tpu.memory_space<vmem>>, vector<32x32xf32>
    %cst_24 = arith.constant dense<0.000000e+00> : vector<16x32xf32>
    %76 = tpu.matmul %74, %75, %cst_24 {dimension_numbers = #tpu.dot_dimension_numbers<[1], [0], [0], [1], [0, 0, 1, 1], [], []>} : vector<16x32xf32>, vector<32x32xf32>, vector<16x32xf32> -> vector<16x32xf32>
    %c152 = arith.constant 152 : index
    %c0_25 = arith.constant 0 : index
    %77 = vector.load %arg1[%c152, %c0_25] : memref<664x128xf32, #tpu.memory_space<vmem>>, vector<1x32xf32>
    %78 = vector.broadcast %77 : vector<1x32xf32> to vector<16x32xf32>
    %79 = arith.addf %76, %78 : vector<16x32xf32>
    %80 = arith.addf %79, %35 : vector<16x32xf32>
    %c160 = arith.constant 160 : index
    %c0_26 = arith.constant 0 : index
    %81 = vector.load %arg1[%c160, %c0_26] : memref<664x128xf32, #tpu.memory_space<vmem>>, vector<1x32xf32>
    %c168 = arith.constant 168 : index
    %c0_27 = arith.constant 0 : index
    %82 = vector.load %arg1[%c168, %c0_27] : memref<664x128xf32, #tpu.memory_space<vmem>>, vector<1x32xf32>
    %cst_28 = arith.constant dense<0.000000e+00> : vector<16xf32>
    %83 = vector.multi_reduction <add>, %80, %cst_28 [1] : vector<16x32xf32> to vector<16xf32>
    %84 = vector.shape_cast %83 : vector<16xf32> to vector<16x1xf32>
    %cst_29 = arith.constant 3.200000e+01 : f32
    %85 = vector.broadcast %cst_29 : f32 to vector<16x1xf32>
    %86 = arith.divf %84, %85 : vector<16x1xf32>
    %87 = vector.broadcast %86 : vector<16x1xf32> to vector<16x32xf32>
    %88 = arith.subf %80, %87 : vector<16x32xf32>
    %89 = arith.mulf %88, %88 : vector<16x32xf32>
    %cst_30 = arith.constant dense<0.000000e+00> : vector<16xf32>
    %90 = vector.multi_reduction <add>, %89, %cst_30 [1] : vector<16x32xf32> to vector<16xf32>
    %91 = vector.shape_cast %90 : vector<16xf32> to vector<16x1xf32>
    %cst_31 = arith.constant 3.200000e+01 : f32
    %92 = vector.broadcast %cst_31 : f32 to vector<16x1xf32>
    %93 = arith.divf %91, %92 : vector<16x1xf32>
    %94 = vector.broadcast %86 : vector<16x1xf32> to vector<16x32xf32>
    %95 = arith.subf %80, %94 : vector<16x32xf32>
    %cst_32 = arith.constant 1.000000e-07 : f32
    %96 = vector.broadcast %cst_32 : f32 to vector<16x1xf32>
    %97 = arith.addf %93, %96 : vector<16x1xf32>
    %98 = math.rsqrt %97 : vector<16x1xf32>
    %99 = vector.broadcast %98 : vector<16x1xf32> to vector<16x32xf32>
    %100 = arith.mulf %95, %99 : vector<16x32xf32>
    %101 = vector.broadcast %81 : vector<1x32xf32> to vector<16x32xf32>
    %102 = arith.mulf %100, %101 : vector<16x32xf32>
    %103 = vector.broadcast %82 : vector<1x32xf32> to vector<16x32xf32>
    %104 = arith.addf %102, %103 : vector<16x32xf32>
    %c176 = arith.constant 176 : index
    %c0_33 = arith.constant 0 : index
    %105 = vector.load %arg1[%c176, %c0_33] : memref<664x128xf32, #tpu.memory_space<vmem>>, vector<32x64xf32>
    %cst_34 = arith.constant dense<0.000000e+00> : vector<16x64xf32>
    %106 = tpu.matmul %104, %105, %cst_34 {dimension_numbers = #tpu.dot_dimension_numbers<[1], [0], [0], [1], [0, 0, 1, 1], [], []>} : vector<16x32xf32>, vector<32x64xf32>, vector<16x64xf32> -> vector<16x64xf32>
    %c208 = arith.constant 208 : index
    %c0_35 = arith.constant 0 : index
    %107 = vector.load %arg1[%c208, %c0_35] : memref<664x128xf32, #tpu.memory_space<vmem>>, vector<1x64xf32>
    %108 = vector.broadcast %107 : vector<1x64xf32> to vector<16x64xf32>
    %109 = arith.addf %106, %108 : vector<16x64xf32>
    %110 = arith.mulf %109, %109 : vector<16x64xf32>
    %111 = arith.mulf %109, %110 : vector<16x64xf32>
    %cst_36 = arith.constant 4.471500e-02 : f32
    %112 = vector.broadcast %cst_36 : f32 to vector<16x64xf32>
    %113 = arith.mulf %112, %111 : vector<16x64xf32>
    %114 = arith.addf %109, %113 : vector<16x64xf32>
    %cst_37 = arith.constant 0.797884583 : f32
    %115 = vector.broadcast %cst_37 : f32 to vector<16x64xf32>
    %116 = arith.mulf %115, %114 : vector<16x64xf32>
    %117 = math.tanh %116 : vector<16x64xf32>
    %cst_38 = arith.constant 1.000000e+00 : f32
    %118 = vector.broadcast %cst_38 : f32 to vector<16x64xf32>
    %119 = arith.addf %118, %117 : vector<16x64xf32>
    %cst_39 = arith.constant 5.000000e-01 : f32
    %120 = vector.broadcast %cst_39 : f32 to vector<16x64xf32>
    %121 = arith.mulf %120, %119 : vector<16x64xf32>
    %122 = arith.mulf %109, %121 : vector<16x64xf32>
    %c216 = arith.constant 216 : index
    %c0_40 = arith.constant 0 : index
    %123 = vector.load %arg1[%c216, %c0_40] : memref<664x128xf32, #tpu.memory_space<vmem>>, vector<64x32xf32>
    %cst_41 = arith.constant dense<0.000000e+00> : vector<16x32xf32>
    %124 = tpu.matmul %122, %123, %cst_41 {dimension_numbers = #tpu.dot_dimension_numbers<[1], [0], [0], [1], [0, 0, 1, 1], [], []>} : vector<16x64xf32>, vector<64x32xf32>, vector<16x32xf32> -> vector<16x32xf32>
    %c280 = arith.constant 280 : index
    %c0_42 = arith.constant 0 : index
    %125 = vector.load %arg1[%c280, %c0_42] : memref<664x128xf32, #tpu.memory_space<vmem>>, vector<1x32xf32>
    %126 = vector.broadcast %125 : vector<1x32xf32> to vector<16x32xf32>
    %127 = arith.addf %124, %126 : vector<16x32xf32>
    %128 = arith.addf %127, %104 : vector<16x32xf32>
    %c288 = arith.constant 288 : index
    %c0_43 = arith.constant 0 : index
    %129 = vector.load %arg1[%c288, %c0_43] : memref<664x128xf32, #tpu.memory_space<vmem>>, vector<1x32xf32>
    %c296 = arith.constant 296 : index
    %c0_44 = arith.constant 0 : index
    %130 = vector.load %arg1[%c296, %c0_44] : memref<664x128xf32, #tpu.memory_space<vmem>>, vector<1x32xf32>
    %cst_45 = arith.constant dense<0.000000e+00> : vector<16xf32>
    %131 = vector.multi_reduction <add>, %128, %cst_45 [1] : vector<16x32xf32> to vector<16xf32>
    %132 = vector.shape_cast %131 : vector<16xf32> to vector<16x1xf32>
    %cst_46 = arith.constant 3.200000e+01 : f32
    %133 = vector.broadcast %cst_46 : f32 to vector<16x1xf32>
    %134 = arith.divf %132, %133 : vector<16x1xf32>
    %135 = vector.broadcast %134 : vector<16x1xf32> to vector<16x32xf32>
    %136 = arith.subf %128, %135 : vector<16x32xf32>
    %137 = arith.mulf %136, %136 : vector<16x32xf32>
    %cst_47 = arith.constant dense<0.000000e+00> : vector<16xf32>
    %138 = vector.multi_reduction <add>, %137, %cst_47 [1] : vector<16x32xf32> to vector<16xf32>
    %139 = vector.shape_cast %138 : vector<16xf32> to vector<16x1xf32>
    %cst_48 = arith.constant 3.200000e+01 : f32
    %140 = vector.broadcast %cst_48 : f32 to vector<16x1xf32>
    %141 = arith.divf %139, %140 : vector<16x1xf32>
    %142 = vector.broadcast %134 : vector<16x1xf32> to vector<16x32xf32>
    %143 = arith.subf %128, %142 : vector<16x32xf32>
    %cst_49 = arith.constant 1.000000e-07 : f32
    %144 = vector.broadcast %cst_49 : f32 to vector<16x1xf32>
    %145 = arith.addf %141, %144 : vector<16x1xf32>
    %146 = math.rsqrt %145 : vector<16x1xf32>
    %147 = vector.broadcast %146 : vector<16x1xf32> to vector<16x32xf32>
    %148 = arith.mulf %143, %147 : vector<16x32xf32>
    %149 = vector.broadcast %129 : vector<1x32xf32> to vector<16x32xf32>
    %150 = arith.mulf %148, %149 : vector<16x32xf32>
    %151 = vector.broadcast %130 : vector<1x32xf32> to vector<16x32xf32>
    %152 = arith.addf %150, %151 : vector<16x32xf32>
    %c304 = arith.constant 304 : index
    %c0_50 = arith.constant 0 : index
    %153 = vector.load %arg1[%c304, %c0_50] : memref<664x128xf32, #tpu.memory_space<vmem>>, vector<32x96xf32>
    %cst_51 = arith.constant dense<0.000000e+00> : vector<16x96xf32>
    %154 = tpu.matmul %152, %153, %cst_51 {dimension_numbers = #tpu.dot_dimension_numbers<[1], [0], [0], [1], [0, 0, 1, 1], [], []>} : vector<16x32xf32>, vector<32x96xf32>, vector<16x96xf32> -> vector<16x96xf32>
    %c336 = arith.constant 336 : index
    %c0_52 = arith.constant 0 : index
    %155 = vector.load %arg1[%c336, %c0_52] : memref<664x128xf32, #tpu.memory_space<vmem>>, vector<1x96xf32>
    %156 = vector.broadcast %155 : vector<1x96xf32> to vector<16x96xf32>
    %157 = arith.addf %154, %156 : vector<16x96xf32>
    %158 = vector.extract_strided_slice %157 {offsets = [0, 0], sizes = [16, 16], strides = [1, 1]} : vector<16x96xf32> to vector<16x16xf32>
    %159 = vector.extract_strided_slice %157 {offsets = [0, 32], sizes = [16, 16], strides = [1, 1]} : vector<16x96xf32> to vector<16x16xf32>
    %160 = vector.extract_strided_slice %157 {offsets = [0, 64], sizes = [16, 16], strides = [1, 1]} : vector<16x96xf32> to vector<16x16xf32>
    %cst_53 = arith.constant dense<0.000000e+00> : vector<16x16xf32>
    %161 = tpu.matmul %158, %159, %cst_53 {dimension_numbers = #tpu.dot_dimension_numbers<[1], [1], [0], [0], [0, 0, 1, 0], [], []>} : vector<16x16xf32>, vector<16x16xf32>, vector<16x16xf32> -> vector<16x16xf32>
    %162 = arith.addf %161, %36 : vector<16x16xf32>
    %cst_54 = arith.constant dense<0xFF800000> : vector<16xf32>
    %163 = vector.multi_reduction <maximumf>, %162, %cst_54 [1] : vector<16x16xf32> to vector<16xf32>
    %164 = vector.shape_cast %163 : vector<16xf32> to vector<16x1xf32>
    %165 = vector.broadcast %164 : vector<16x1xf32> to vector<16x16xf32>
    %166 = arith.subf %162, %165 : vector<16x16xf32>
    %167 = math.exp %166 : vector<16x16xf32>
    %cst_55 = arith.constant dense<0.000000e+00> : vector<16xf32>
    %168 = vector.multi_reduction <add>, %167, %cst_55 [1] : vector<16x16xf32> to vector<16xf32>
    %169 = vector.shape_cast %168 : vector<16xf32> to vector<16x1xf32>
    %170 = tpu.reciprocal %169 {approx = true} : vector<16x1xf32> -> vector<16x1xf32>
    %171 = vector.broadcast %170 : vector<16x1xf32> to vector<16x16xf32>
    %172 = arith.mulf %167, %171 : vector<16x16xf32>
    %cst_56 = arith.constant dense<0.000000e+00> : vector<16x16xf32>
    %173 = tpu.matmul %172, %160, %cst_56 {dimension_numbers = #tpu.dot_dimension_numbers<[1], [0], [0], [1], [0, 0, 1, 1], [], []>} : vector<16x16xf32>, vector<16x16xf32>, vector<16x16xf32> -> vector<16x16xf32>
    %174 = vector.extract_strided_slice %157 {offsets = [0, 16], sizes = [16, 16], strides = [1, 1]} : vector<16x96xf32> to vector<16x16xf32>
    %175 = vector.extract_strided_slice %157 {offsets = [0, 48], sizes = [16, 16], strides = [1, 1]} : vector<16x96xf32> to vector<16x16xf32>
    %176 = vector.extract_strided_slice %157 {offsets = [0, 80], sizes = [16, 16], strides = [1, 1]} : vector<16x96xf32> to vector<16x16xf32>
    %cst_57 = arith.constant dense<0.000000e+00> : vector<16x16xf32>
    %177 = tpu.matmul %174, %175, %cst_57 {dimension_numbers = #tpu.dot_dimension_numbers<[1], [1], [0], [0], [0, 0, 1, 0], [], []>} : vector<16x16xf32>, vector<16x16xf32>, vector<16x16xf32> -> vector<16x16xf32>
    %178 = arith.addf %177, %36 : vector<16x16xf32>
    %cst_58 = arith.constant dense<0xFF800000> : vector<16xf32>
    %179 = vector.multi_reduction <maximumf>, %178, %cst_58 [1] : vector<16x16xf32> to vector<16xf32>
    %180 = vector.shape_cast %179 : vector<16xf32> to vector<16x1xf32>
    %181 = vector.broadcast %180 : vector<16x1xf32> to vector<16x16xf32>
    %182 = arith.subf %178, %181 : vector<16x16xf32>
    %183 = math.exp %182 : vector<16x16xf32>
    %cst_59 = arith.constant dense<0.000000e+00> : vector<16xf32>
    %184 = vector.multi_reduction <add>, %183, %cst_59 [1] : vector<16x16xf32> to vector<16xf32>
    %185 = vector.shape_cast %184 : vector<16xf32> to vector<16x1xf32>
    %186 = tpu.reciprocal %185 {approx = true} : vector<16x1xf32> -> vector<16x1xf32>
    %187 = vector.broadcast %186 : vector<16x1xf32> to vector<16x16xf32>
    %188 = arith.mulf %183, %187 : vector<16x16xf32>
    %cst_60 = arith.constant dense<0.000000e+00> : vector<16x16xf32>
    %189 = tpu.matmul %188, %176, %cst_60 {dimension_numbers = #tpu.dot_dimension_numbers<[1], [0], [0], [1], [0, 0, 1, 1], [], []>} : vector<16x16xf32>, vector<16x16xf32>, vector<16x16xf32> -> vector<16x16xf32>
    %190 = tpu.concatenate %173, %189 in 1 : vector<16x16xf32>, vector<16x16xf32> -> vector<16x32xf32>
    %c344 = arith.constant 344 : index
    %c0_61 = arith.constant 0 : index
    %191 = vector.load %arg1[%c344, %c0_61] : memref<664x128xf32, #tpu.memory_space<vmem>>, vector<32x32xf32>
    %cst_62 = arith.constant dense<0.000000e+00> : vector<16x32xf32>
    %192 = tpu.matmul %190, %191, %cst_62 {dimension_numbers = #tpu.dot_dimension_numbers<[1], [0], [0], [1], [0, 0, 1, 1], [], []>} : vector<16x32xf32>, vector<32x32xf32>, vector<16x32xf32> -> vector<16x32xf32>
    %c376 = arith.constant 376 : index
    %c0_63 = arith.constant 0 : index
    %193 = vector.load %arg1[%c376, %c0_63] : memref<664x128xf32, #tpu.memory_space<vmem>>, vector<1x32xf32>
    %194 = vector.broadcast %193 : vector<1x32xf32> to vector<16x32xf32>
    %195 = arith.addf %192, %194 : vector<16x32xf32>
    %196 = arith.addf %195, %152 : vector<16x32xf32>
    %c384 = arith.constant 384 : index
    %c0_64 = arith.constant 0 : index
    %197 = vector.load %arg1[%c384, %c0_64] : memref<664x128xf32, #tpu.memory_space<vmem>>, vector<1x32xf32>
    %c392 = arith.constant 392 : index
    %c0_65 = arith.constant 0 : index
    %198 = vector.load %arg1[%c392, %c0_65] : memref<664x128xf32, #tpu.memory_space<vmem>>, vector<1x32xf32>
    %cst_66 = arith.constant dense<0.000000e+00> : vector<16xf32>
    %199 = vector.multi_reduction <add>, %196, %cst_66 [1] : vector<16x32xf32> to vector<16xf32>
    %200 = vector.shape_cast %199 : vector<16xf32> to vector<16x1xf32>
    %cst_67 = arith.constant 3.200000e+01 : f32
    %201 = vector.broadcast %cst_67 : f32 to vector<16x1xf32>
    %202 = arith.divf %200, %201 : vector<16x1xf32>
    %203 = vector.broadcast %202 : vector<16x1xf32> to vector<16x32xf32>
    %204 = arith.subf %196, %203 : vector<16x32xf32>
    %205 = arith.mulf %204, %204 : vector<16x32xf32>
    %cst_68 = arith.constant dense<0.000000e+00> : vector<16xf32>
    %206 = vector.multi_reduction <add>, %205, %cst_68 [1] : vector<16x32xf32> to vector<16xf32>
    %207 = vector.shape_cast %206 : vector<16xf32> to vector<16x1xf32>
    %cst_69 = arith.constant 3.200000e+01 : f32
    %208 = vector.broadcast %cst_69 : f32 to vector<16x1xf32>
    %209 = arith.divf %207, %208 : vector<16x1xf32>
    %210 = vector.broadcast %202 : vector<16x1xf32> to vector<16x32xf32>
    %211 = arith.subf %196, %210 : vector<16x32xf32>
    %cst_70 = arith.constant 1.000000e-07 : f32
    %212 = vector.broadcast %cst_70 : f32 to vector<16x1xf32>
    %213 = arith.addf %209, %212 : vector<16x1xf32>
    %214 = math.rsqrt %213 : vector<16x1xf32>
    %215 = vector.broadcast %214 : vector<16x1xf32> to vector<16x32xf32>
    %216 = arith.mulf %211, %215 : vector<16x32xf32>
    %217 = vector.broadcast %197 : vector<1x32xf32> to vector<16x32xf32>
    %218 = arith.mulf %216, %217 : vector<16x32xf32>
    %219 = vector.broadcast %198 : vector<1x32xf32> to vector<16x32xf32>
    %220 = arith.addf %218, %219 : vector<16x32xf32>
    %c400 = arith.constant 400 : index
    %c0_71 = arith.constant 0 : index
    %221 = vector.load %arg1[%c400, %c0_71] : memref<664x128xf32, #tpu.memory_space<vmem>>, vector<32x64xf32>
    %cst_72 = arith.constant dense<0.000000e+00> : vector<16x64xf32>
    %222 = tpu.matmul %220, %221, %cst_72 {dimension_numbers = #tpu.dot_dimension_numbers<[1], [0], [0], [1], [0, 0, 1, 1], [], []>} : vector<16x32xf32>, vector<32x64xf32>, vector<16x64xf32> -> vector<16x64xf32>
    %c432 = arith.constant 432 : index
    %c0_73 = arith.constant 0 : index
    %223 = vector.load %arg1[%c432, %c0_73] : memref<664x128xf32, #tpu.memory_space<vmem>>, vector<1x64xf32>
    %224 = vector.broadcast %223 : vector<1x64xf32> to vector<16x64xf32>
    %225 = arith.addf %222, %224 : vector<16x64xf32>
    %226 = arith.mulf %225, %225 : vector<16x64xf32>
    %227 = arith.mulf %225, %226 : vector<16x64xf32>
    %cst_74 = arith.constant 4.471500e-02 : f32
    %228 = vector.broadcast %cst_74 : f32 to vector<16x64xf32>
    %229 = arith.mulf %228, %227 : vector<16x64xf32>
    %230 = arith.addf %225, %229 : vector<16x64xf32>
    %cst_75 = arith.constant 0.797884583 : f32
    %231 = vector.broadcast %cst_75 : f32 to vector<16x64xf32>
    %232 = arith.mulf %231, %230 : vector<16x64xf32>
    %233 = math.tanh %232 : vector<16x64xf32>
    %cst_76 = arith.constant 1.000000e+00 : f32
    %234 = vector.broadcast %cst_76 : f32 to vector<16x64xf32>
    %235 = arith.addf %234, %233 : vector<16x64xf32>
    %cst_77 = arith.constant 5.000000e-01 : f32
    %236 = vector.broadcast %cst_77 : f32 to vector<16x64xf32>
    %237 = arith.mulf %236, %235 : vector<16x64xf32>
    %238 = arith.mulf %225, %237 : vector<16x64xf32>
    %c440 = arith.constant 440 : index
    %c0_78 = arith.constant 0 : index
    %239 = vector.load %arg1[%c440, %c0_78] : memref<664x128xf32, #tpu.memory_space<vmem>>, vector<64x32xf32>
    %cst_79 = arith.constant dense<0.000000e+00> : vector<16x32xf32>
    %240 = tpu.matmul %238, %239, %cst_79 {dimension_numbers = #tpu.dot_dimension_numbers<[1], [0], [0], [1], [0, 0, 1, 1], [], []>} : vector<16x64xf32>, vector<64x32xf32>, vector<16x32xf32> -> vector<16x32xf32>
    %c504 = arith.constant 504 : index
    %c0_80 = arith.constant 0 : index
    %241 = vector.load %arg1[%c504, %c0_80] : memref<664x128xf32, #tpu.memory_space<vmem>>, vector<1x32xf32>
    %242 = vector.broadcast %241 : vector<1x32xf32> to vector<16x32xf32>
    %243 = arith.addf %240, %242 : vector<16x32xf32>
    %244 = arith.addf %243, %220 : vector<16x32xf32>
    %c512 = arith.constant 512 : index
    %c0_81 = arith.constant 0 : index
    %245 = vector.load %arg1[%c512, %c0_81] : memref<664x128xf32, #tpu.memory_space<vmem>>, vector<1x32xf32>
    %c520 = arith.constant 520 : index
    %c0_82 = arith.constant 0 : index
    %246 = vector.load %arg1[%c520, %c0_82] : memref<664x128xf32, #tpu.memory_space<vmem>>, vector<1x32xf32>
    %cst_83 = arith.constant dense<0.000000e+00> : vector<16xf32>
    %247 = vector.multi_reduction <add>, %244, %cst_83 [1] : vector<16x32xf32> to vector<16xf32>
    %248 = vector.shape_cast %247 : vector<16xf32> to vector<16x1xf32>
    %cst_84 = arith.constant 3.200000e+01 : f32
    %249 = vector.broadcast %cst_84 : f32 to vector<16x1xf32>
    %250 = arith.divf %248, %249 : vector<16x1xf32>
    %251 = vector.broadcast %250 : vector<16x1xf32> to vector<16x32xf32>
    %252 = arith.subf %244, %251 : vector<16x32xf32>
    %253 = arith.mulf %252, %252 : vector<16x32xf32>
    %cst_85 = arith.constant dense<0.000000e+00> : vector<16xf32>
    %254 = vector.multi_reduction <add>, %253, %cst_85 [1] : vector<16x32xf32> to vector<16xf32>
    %255 = vector.shape_cast %254 : vector<16xf32> to vector<16x1xf32>
    %cst_86 = arith.constant 3.200000e+01 : f32
    %256 = vector.broadcast %cst_86 : f32 to vector<16x1xf32>
    %257 = arith.divf %255, %256 : vector<16x1xf32>
    %258 = vector.broadcast %250 : vector<16x1xf32> to vector<16x32xf32>
    %259 = arith.subf %244, %258 : vector<16x32xf32>
    %cst_87 = arith.constant 1.000000e-07 : f32
    %260 = vector.broadcast %cst_87 : f32 to vector<16x1xf32>
    %261 = arith.addf %257, %260 : vector<16x1xf32>
    %262 = math.rsqrt %261 : vector<16x1xf32>
    %263 = vector.broadcast %262 : vector<16x1xf32> to vector<16x32xf32>
    %264 = arith.mulf %259, %263 : vector<16x32xf32>
    %265 = vector.broadcast %245 : vector<1x32xf32> to vector<16x32xf32>
    %266 = arith.mulf %264, %265 : vector<16x32xf32>
    %267 = vector.broadcast %246 : vector<1x32xf32> to vector<16x32xf32>
    %268 = arith.addf %266, %267 : vector<16x32xf32>
    %269 = vector.extract_strided_slice %268 {offsets = [0, 0], sizes = [1, 32], strides = [1, 1]} : vector<16x32xf32> to vector<1x32xf32>
    %270 = vector.extract_strided_slice %268 {offsets = [8, 0], sizes = [1, 32], strides = [1, 1]} : vector<16x32xf32> to vector<1x32xf32>
    %271 = tpu.concatenate %269, %270 in 0 : vector<1x32xf32>, vector<1x32xf32> -> vector<2x32xf32>
    %c528 = arith.constant 528 : index
    %c0_88 = arith.constant 0 : index
    %272 = vector.load %arg1[%c528, %c0_88] : memref<664x128xf32, #tpu.memory_space<vmem>>, vector<32x32xf32>
    %cst_89 = arith.constant dense<0.000000e+00> : vector<2x32xf32>
    %273 = tpu.matmul %271, %272, %cst_89 {dimension_numbers = #tpu.dot_dimension_numbers<[1], [0], [0], [1], [0, 0, 1, 1], [], []>} : vector<2x32xf32>, vector<32x32xf32>, vector<2x32xf32> -> vector<2x32xf32>
    %c560 = arith.constant 560 : index
    %c0_90 = arith.constant 0 : index
    %274 = vector.load %arg1[%c560, %c0_90] : memref<664x128xf32, #tpu.memory_space<vmem>>, vector<1x32xf32>
    %275 = vector.broadcast %274 : vector<1x32xf32> to vector<2x32xf32>
    %276 = arith.addf %273, %275 : vector<2x32xf32>
    %277 = arith.mulf %276, %276 : vector<2x32xf32>
    %278 = arith.mulf %276, %277 : vector<2x32xf32>
    %cst_91 = arith.constant 4.471500e-02 : f32
    %279 = vector.broadcast %cst_91 : f32 to vector<2x32xf32>
    %280 = arith.mulf %279, %278 : vector<2x32xf32>
    %281 = arith.addf %276, %280 : vector<2x32xf32>
    %cst_92 = arith.constant 0.797884583 : f32
    %282 = vector.broadcast %cst_92 : f32 to vector<2x32xf32>
    %283 = arith.mulf %282, %281 : vector<2x32xf32>
    %284 = math.tanh %283 : vector<2x32xf32>
    %cst_93 = arith.constant 1.000000e+00 : f32
    %285 = vector.broadcast %cst_93 : f32 to vector<2x32xf32>
    %286 = arith.addf %285, %284 : vector<2x32xf32>
    %cst_94 = arith.constant 5.000000e-01 : f32
    %287 = vector.broadcast %cst_94 : f32 to vector<2x32xf32>
    %288 = arith.mulf %287, %286 : vector<2x32xf32>
    %289 = arith.mulf %276, %288 : vector<2x32xf32>
    %c568 = arith.constant 568 : index
    %c0_95 = arith.constant 0 : index
    %290 = vector.load %arg1[%c568, %c0_95] : memref<664x128xf32, #tpu.memory_space<vmem>>, vector<32x16xf32>
    %cst_96 = arith.constant dense<0.000000e+00> : vector<2x16xf32>
    %291 = tpu.matmul %289, %290, %cst_96 {dimension_numbers = #tpu.dot_dimension_numbers<[1], [0], [0], [1], [0, 0, 1, 1], [], []>} : vector<2x32xf32>, vector<32x16xf32>, vector<2x16xf32> -> vector<2x16xf32>
    %c600 = arith.constant 600 : index
    %c0_97 = arith.constant 0 : index
    %292 = vector.load %arg1[%c600, %c0_97] : memref<664x128xf32, #tpu.memory_space<vmem>>, vector<1x16xf32>
    %293 = vector.broadcast %292 : vector<1x16xf32> to vector<2x16xf32>
    %294 = arith.addf %291, %293 : vector<2x16xf32>
    %c624 = arith.constant 624 : index
    %c0_98 = arith.constant 0 : index
    %295 = vector.load %arg1[%c624, %c0_98] : memref<664x128xf32, #tpu.memory_space<vmem>>, vector<1x16xf32>
    %296 = vector.broadcast %295 : vector<1x16xf32> to vector<2x16xf32>
    %297 = arith.subf %294, %296 : vector<2x16xf32>
    %c632 = arith.constant 632 : index
    %c0_99 = arith.constant 0 : index
    %298 = vector.load %arg1[%c632, %c0_99] : memref<664x128xf32, #tpu.memory_space<vmem>>, vector<1x16xf32>
    %cst_100 = arith.constant 9.99999974E-6 : f32
    %299 = vector.broadcast %cst_100 : f32 to vector<1x16xf32>
    %300 = arith.addf %298, %299 : vector<1x16xf32>
    %301 = math.rsqrt %300 : vector<1x16xf32>
    %302 = vector.broadcast %301 : vector<1x16xf32> to vector<2x16xf32>
    %303 = arith.mulf %297, %302 : vector<2x16xf32>
    %c608 = arith.constant 608 : index
    %c0_101 = arith.constant 0 : index
    %304 = vector.load %arg1[%c608, %c0_101] : memref<664x128xf32, #tpu.memory_space<vmem>>, vector<1x16xf32>
    %305 = vector.broadcast %304 : vector<1x16xf32> to vector<2x16xf32>
    %306 = arith.mulf %303, %305 : vector<2x16xf32>
    %c616 = arith.constant 616 : index
    %c0_102 = arith.constant 0 : index
    %307 = vector.load %arg1[%c616, %c0_102] : memref<664x128xf32, #tpu.memory_space<vmem>>, vector<1x16xf32>
    %308 = vector.broadcast %307 : vector<1x16xf32> to vector<2x16xf32>
    %309 = arith.addf %306, %308 : vector<2x16xf32>
    %cst_103 = arith.constant 0.000000e+00 : f32
    %310 = vector.broadcast %cst_103 : f32 to vector<2x16xf32>
    %311 = arith.maximumf %309, %310 : vector<2x16xf32>
    %c640 = arith.constant 640 : index
    %c0_104 = arith.constant 0 : index
    %312 = vector.load %arg1[%c640, %c0_104] : memref<664x128xf32, #tpu.memory_space<vmem>>, vector<16x128xf32>
    %cst_105 = arith.constant dense<0.000000e+00> : vector<2x128xf32>
    %313 = tpu.matmul %311, %312, %cst_105 {dimension_numbers = #tpu.dot_dimension_numbers<[1], [0], [0], [1], [0, 0, 1, 1], [], []>} : vector<2x16xf32>, vector<16x128xf32>, vector<2x128xf32> -> vector<2x128xf32>
    %c656 = arith.constant 656 : index
    %c0_106 = arith.constant 0 : index
    %314 = vector.load %arg1[%c656, %c0_106] : memref<664x128xf32, #tpu.memory_space<vmem>>, vector<1x128xf32>
    %315 = vector.broadcast %314 : vector<1x128xf32> to vector<2x128xf32>
    %316 = arith.addf %313, %315 : vector<2x128xf32>
    %c0_107 = arith.constant 0 : index
    %c0_108 = arith.constant 0 : index
    %317 = vector.load %arg2[%c0_107, %c0_108] : memref<2x128xf32, #tpu.memory_space<vmem>>, vector<2x128xf32>
    tpu.vector_store %arg2[%c0_107, %c0_108], %316 {strides = array<i32>} : memref<2x128xf32, #tpu.memory_space<vmem>>, vector<2x128xf32>,
    return
  }
}

</mosaic_0001>

<bundles_post_ra>
// kernel: deberta_forward.1
= control target key start
LH: loop header
LB: loop body
LE: loop exit
PB: predicated region body
PF: predicated region fallthrough
CT: control target
= control target key end

     0   :  { %7 = vsyncpa [#allocation3], 0  ;;  %s3021_s0 = inlined_call_operand.vmem [shape: f32[16,128], index: 0, kind: input, shape index: {}]   ;;  %s3022_s1 = inlined_call_operand.hbm [shape: f32[664,128], index: 1, kind: input, shape index: {}]   ;;  %s3023_s2 = inlined_call_operand.hbm [shape: f32[2,128], index: 2, kind: output, shape index: {}]  }
   0x1   :  { %8 = vsyncpa [#allocation4], 0  ;;  %s2763_s9 = smov [#allocation2]  }
   0x2   :  { %s16_s10 = sshll.u32 %s2763_s9, 4  ;;  %s17_s10 = int_to_ptr.vmem [resolvable:$true] %s16_s10 }
   0x3   :  { %s2727_s11 = scalar_lea.vmem %s17_s10, 10624  ;;  %p2732_p1 = scmp.lt.s32.totalorder %s17_s10, %s17_s10 }
   0x4   :  { %p2728_p0 = scmp.ne.s32.totalorder %s17_s10, %s2727_s11  ;;  %p2733_p2 = scmp.lt.s32.totalorder %s2727_s11, %s2727_s11 }
   0x6   :  { %p2734_p3 = por %p2733_p2, %p2732_p1 }
   0x8   :  { %p2735_p4 = pnand %p2734_p3, %p2728_p0 }
   0xa   :  { %2738 = shalt.err (!%p2735_p4)
}
   0xb   :  { %s2764_s12 = smov 128   ;;  %s2765_s13 = smov 8  }
   0xc   :  { %22 = dma.hbm_to_vmem [thread:$0]  %s3022_s1, 10624, %s17_s10, [#allocation3], %s2764_s12, %s2764_s12, %s2765_s13  }
   0xd   :  { %2759 = dma.done.wait [#allocation3], 10624  }
   0xe   :  { %2760 = vsyncadd [#allocation3], 4294956672  ;;  %v2766_v0 = vmov 0   ;;  %v2798_v1 = vld [vmem:[%s3021_s0] sm:$0xff]  ;;  %v2803_v2 = vld [vmem:[%s3021_s0 + $0x8] sm:$0xff]  ;;  %v30_v15 = vlaneseq  ;;  %vm52_vm0 = vcmask 523264  }
   0xf   :  { %2652 = vset.pattern.permute.xlu0 %v2766_v0  ;;  %v51_v3 = vld [vmem:[#allocation2 + $0x38] sm:$0xff]  ;;  %v2634_v4 = vtrunc.f32 %v2798_v1  ;;  %v2636_v5 = vtrunc.f32 %v2803_v2  ;;  %v50_v6 = vld [vmem:[#allocation2 + $0x30] sm:$0xff]  ;;  %v49_v7 = vld [vmem:[#allocation2 + $0x28] sm:$0xff]  ;;  %v2767_v18 = vmov 0.0   ;;  %vm136_vm3 = vcmask 261120   ;;  %s2769_s0 = smov 80  }
  0x10   :  { %2426 = vmatprep.subr.mxu0 %v51_v3  ;;  %v48_v9 = vld [vmem:[#allocation2 + $0x20] sm:$0xff]  ;;  %v47_v11 = vld [vmem:[#allocation2 + $0x18] sm:$0xff]  ;;  %v46_v12 = vld [vmem:[#allocation2 + $0x10] sm:$0xff]  ;;  %v31_v16 = vand.u32 127, %v30_v15  ;;  %v2768_v26 = vmov 1   ;;  %vm290_vm4 = vcmask 130048  }
  0x11   :  { %2427 = vmatpush3.msra.mxu0 %v51_v3  ;;  %v2635_v8 = vcvt.f32.s32 %v2634_v4  ;;  %v2637_v10 = vcvt.f32.s32 %v2636_v5  ;;  %v45_v13 = vld [vmem:[#allocation2 + $0x8] sm:$0xff]  ;;  %v44_v14 = vld [vmem:[#allocation2] sm:$0xff]  ;;  %2653 = vset.pattern.permute.xlu1 %v2768_v26  ;;  %v189_v39 = vld [vmem:[#allocation2 + $0x58] sm:$0xff]  ;;  %s2770_s1 = smov 96   ;;  %s2771_s20 = smov 112   ;;  %vm2775_vm5 = vmmov 0  }
  0x12   :  { %2428 = vmatprep.subr.mxu0 %v50_v6  ;;  %v191_v37 = vld [vmem:[#allocation2 + $0x68] sm:$0xff]  ;;  %v190_v38 = vld [vmem:[#allocation2 + $0x60] sm:$0xff]  ;;  %v188_v40 = vld [vmem:[#allocation2 + $0x50] sm:$0xff]  ;;  %s2772_s21 = smov 64   ;;  %s2773_s22 = smov 48   ;;  %vm1946_vm6 = vcmask 1040384  }
  0x13   :  { %2429 = vmatpush3.msra.mxu0 %v50_v6  ;;  %33 = vperm.xlu0 %2652, %v2635_v8   ;;  %v2248_v48 = vld [vmem:[#allocation2 + $0x40] ss:$0 sm:$0xff]  ;;  %v2249_v50 = vld [vmem:[#allocation2 + $0x48] ss:$0 sm:$0xff]  ;;  %v2250_v61 = vld [vmem:[#allocation2 + $0x70] ss:$0 sm:$0xff] }
  0x14   :  { %2430 = vmatprep.subr.mxu0 %v49_v7  ;;  %2445 = vmatprep.subr.mxu1 %v191_v37  ;;  %s2774_s23 = smov 16   ;;  %s2776_s24 = smov [#allocation5]  }
  0x15   :  { %2431 = vmatpush3.msra.mxu0 %v49_v7  ;;  %2446 = vmatpush3.msra.mxu1 %v191_v37  ;;  %s2235_s25 = sshll.u32 %s2776_s24, 4  ;;  %s2236_s25 = int_to_ptr.vmem [resolvable:$true] %s2235_s25 }
  0x16   :  { %2432 = vmatprep.subr.mxu0 %v48_v9  ;;  %2447 = vmatprep.subr.mxu1 %v190_v38  ;;  %s2739_s26 = scalar_lea.vmem %s2236_s25, 32  ;;  %p2744_p6 = scmp.lt.s32.totalorder %s2236_s25, %s2236_s25 }
  0x17   :  { %2433 = vmatpush3.msra.mxu0 %v48_v9  ;;  %36 = vperm.xlu0 %2652, %v2637_v10   ;;  %p2740_p5 = scmp.ne.s32.totalorder %s2236_s25, %s2739_s26  ;;  %p2745_p7 = scmp.lt.s32.totalorder %s2739_s26, %s2739_s26 }
  0x18   :  { %2434 = vmatprep.subr.mxu0 %v47_v11  ;;  %2448 = vmatpush3.msra.mxu1 %v190_v38 }
  0x19   :  { %2435 = vmatpush3.msra.mxu0 %v47_v11  ;;  %2449 = vmatprep.subr.mxu1 %v189_v39  ;;  %p2746_p8 = por %p2745_p7, %p2744_p6 }
  0x1a   :  { %2436 = vmatprep.subr.mxu0 %v46_v12  ;;  %2450 = vmatpush3.msra.mxu1 %v189_v39 }
  0x1b   :  { %2437 = vmatpush3.msra.mxu0 %v46_v12  ;;  %2654 = vset.pattern.permute.xlu0 %v2768_v26  ;;  %p2747_p9 = pnand %p2746_p8, %p2740_p5 }
  0x1c   :  { %2438 = vmatprep.subr.mxu0 %v45_v13  ;;  %2451 = vmatprep.subr.mxu1 %v188_v40 }
  0x1d   :  { %2439 = vmatpush3.msra.mxu0 %v45_v13  ;;  %2452 = vmatpush3.msra.mxu1 %v188_v40 }
  0x1e   :  { %2440 = vmatprep.subr.mxu0 %v44_v14 }
  0x1f   :  { %2441 = vmatpush3.msra.mxu0 %v44_v14 }
  0x8e   :  { %v34_v17 = vpop.permute.xlu0 %33 }
  0x8f   :  { %vm38_vm1 = vcmp.eq.s32.totalorder %v34_v17, %v31_v16 }
  0x90   :  { %v2244_v19 = vsel %vm38_vm1, 1.0, %v2767_v18 }
  0x91   :  { %2442 = vmatprep.mubr.msk.f32.mxu0 %vm52_vm0, %v2244_v19 }
  0x92   :  { %v37_v20 = vpop.permute.xlu0 %36 }
  0x93   :  { %vm39_vm2 = vcmp.eq.s32.totalorder %v37_v20, %v31_v16 }
  0x94   :  { %v2245_v21 = vsel %vm39_vm2, 1.0, %v2767_v18 }
  0x95   :  { %2443 = vmatmul.mubr.msk.f32.vlgmr.msra.gmra.mxu0 %vm52_vm0, %v2245_v21 }
 0x155   :  { %v2444_v22 = vpop.f32.mrf.mxu0 }
 0x156   :  { %v140_v25 = vsel %vm136_vm3, %v2444_v22, 0.0 }
 0x157   :  { %v125_v23 = vpop.f32.mrf.mxu0 }
 0x158   :  { %v137_v24 = vsel %vm136_vm3, %v125_v23, 0.0 }
 0x159   :  { %138 = vadd.xlane.f32.xlu1 %v137_v24 }
 0x15d   :  { %141 = vadd.xlane.f32.xlu1 %v140_v25 }
 0x1e2   :  { %v139_v27 = vpop.xlane.xlu1 %138 }
 0x1e3   :  { %v144_v28 = vmul.f32 0.03125, %v139_v27 }
 0x1e5   :  { %v146_v29 = vsub.f32 %v125_v23, %v144_v28 }
 0x1e6   :  { %v142_v30 = vpop.xlane.xlu1 %141 }
 0x1e7   :  { %v145_v31 = vmul.f32 0.03125, %v142_v30  ;;  %v148_v32 = vmul.f32 %v146_v29, %v146_v29 }
 0x1e9   :  { %v147_v33 = vsub.f32 %v2444_v22, %v145_v31  ;;  %v150_v34 = vsel %vm136_vm3, %v148_v32, 0.0 }
 0x1ea   :  { %151 = vadd.xlane.f32.xlu0 %v150_v34 }
 0x1eb   :  { %v149_v35 = vmul.f32 %v147_v33, %v147_v33 }
 0x1ed   :  { %v153_v36 = vsel %vm136_vm3, %v149_v35, 0.0 }
 0x1ee   :  { %154 = vadd.xlane.f32.xlu1 %v153_v36 }
 0x1ff   :  { %178 = vperm.xlu1 %2653, %v2798_v1  }
 0x203   :  { %183 = vperm.xlu1 %2653, %v2803_v2  }
 0x273   :  { %v152_v41 = vpop.xlane.xlu0 %151 }
 0x274   :  { %v156_v42 = vmul.f32 0.03125, %v152_v41 }
 0x276   :  { %v158_v43 = vadd.f32 1e-07, %v156_v42 }
 0x277   :  { %v155_v44 = vpop.xlane.xlu1 %154 }
 0x278   :  { %2655 = vrsqrt.f32 %v158_v43  ;;  %v157_v45 = vmul.f32 0.03125, %v155_v44 }
 0x27a   :  { %v159_v46 = vadd.f32 1e-07, %v157_v45 }
 0x27b   :  { %v179_v53 = vpop.permute.xlu1 %178 }
 0x27c   :  { %2657 = vrsqrt.f32 %v159_v46 }
 0x27f   :  { %v184_v59 = vpop.permute.xlu1 %183 }
 0x285   :  { %v2656_v47 = vpop.eup %2655 }
 0x286   :  { %v162_v49 = vmul.f32 %v2656_v47, %v146_v29 }
 0x288   :  { %v168_v51 = vmul.f32 %v2248_v48, %v162_v49 }
 0x289   :  { %v2658_v52 = vpop.eup %2657 }
 0x28a   :  { %v174_v54 = vadd.f32 %v2249_v50, %v168_v51  ;;  %v163_v55 = vmul.f32 %v2658_v52, %v147_v33 }
 0x28c   :  { %v2818_v56 = vmul.f32 %v179_v53, %v174_v54  ;;  %v169_v57 = vmul.f32 %v2248_v48, %v163_v55 }
 0x28e   :  { %v175_v58 = vadd.f32 %v2249_v50, %v169_v57  ;;  %2453 = vmatprep.mubr.msk.f32.mxu1 %vm136_vm3, %v2818_v56 }
 0x290   :  { %v2822_v60 = vmul.f32 %v184_v59, %v175_v58 }
 0x292   :  { %2454 = vmatmul.mubr.msk.f32.vlgmr.msra.gmra.mxu1 %vm136_vm3, %v2822_v60 }
 0x352   :  { %v2455_v62 = vpop.f32.mrf.mxu1 }
 0x353   :  { %v2826_v63 = vadd.f32 %v2455_v62, %v2250_v61  ;;  %v696_v62 = vld [vmem:[#allocation2 + $0x90] sm:$0xff] }
 0x354   :  { %v269_v0 = vpop.f32.mrf.mxu1 }
 0x355   :  { %v2828_v3 = vadd.f32 %v2250_v61, %v269_v0  ;;  %489 = vrot.lane.b32.xlu0 %v2826_v63, %s2769_s0  ;;  %282 = vrot.lane.b32.xlu1 %v2826_v63, %s2770_s1  ;;  %v694_v0 = vld [vmem:[#allocation2 + $0x80] sm:$0xff] }
 0x357   :  { %2460 = vmatprep.mubr.msk.f32.mxu1 %vm290_vm4, %v2828_v3 }
 0x359   :  { %280 = vrot.lane.b32.xlu1 %v2828_v3, %s2770_s1 }
 0x35d   :  { %487 = vrot.lane.b32.xlu1 %v2828_v3, %s2769_s0 }
 0x361   :  { %483 = vrot.lane.b32.xlu1 %v2828_v3, %s2771_s20 }
 0x365   :  { %485 = vrot.lane.b32.xlu1 %v2826_v63, %s2771_s20 }
 0x369   :  { %284 = vrot.lane.b32.xlu1 %v2798_v1, %s2770_s1 }
 0x36d   :  { %286 = vrot.lane.b32.xlu1 %v2803_v2, %s2770_s1 }
 0x3c7   :  { %v283_v4 = vpop.permute.xlu1 %282  ;;  %v490_v6 = vpop.permute.xlu0 %489 }
 0x3c8   :  { %2456 = vmatprep.subr.msk.mxu1 %vm290_vm4, %v283_v4 }
 0x3c9   :  { %2457 = vmatpush3.xpose.msk.msra.mxu1 %vm290_vm4, %v283_v4 }
 0x3cb   :  { %v281_v5 = vpop.permute.xlu1 %280 }
 0x3cc   :  { %2458 = vmatprep.subr.msk.mxu1 %vm290_vm4, %v281_v5 }
 0x3cd   :  { %2459 = vmatpush3.xpose.msk.msra.mxu1 %vm290_vm4, %v281_v5 }
 0x3ce   :  { %2470 = vmatprep.subr.msk.mxu1 %vm290_vm4, %v490_v6 }
 0x3cf   :  { %v488_v7 = vpop.permute.xlu1 %487 }
 0x3d0   :  { %2461 = vmatmul.mubr.msk.f32.vlgmr.msra.gmra.mxu1 %vm290_vm4, %v2826_v63 }
 0x3d1   :  { %2471 = vmatpush3.xpose.msk.msra.mxu1 %vm290_vm4, %v490_v6 }
 0x3d2   :  { %2472 = vmatprep.subr.msk.mxu1 %vm290_vm4, %v488_v7 }
 0x3d3   :  { %v484_v1 = vpop.permute.xlu1 %483 }
 0x3d4   :  { %2474 = vmatprep.mubr.msk.f32.mxu1 %vm290_vm4, %v484_v1 }
 0x3d5   :  { %2473 = vmatpush3.xpose.msk.msra.mxu1 %vm290_vm4, %v488_v7 }
 0x3d7   :  { %v486_v2 = vpop.permute.xlu1 %485 }
 0x3d8   :  { %2475 = vmatmul.mubr.msk.f32.vlgmr.msra.gmra.mxu1 %vm290_vm4, %v486_v2 }
 0x3db   :  { %v2860_v8 = vpop.permute.xlu1 %284 }
 0x3df   :  { %v2862_v9 = vpop.permute.xlu1 %286 }
 0x490   :  { %v2462_v10 = vpop.f32.mrf.mxu1 }
 0x491   :  { %v371_v11 = vadd.f32 %v2462_v10, %v2862_v9 }
 0x492   :  { %v365_v12 = vpop.f32.mrf.mxu1 }
 0x493   :  { %v366_v13 = vadd.f32 %v365_v12, %v2860_v8  ;;  %v377_v14 = vsel %vm290_vm4, %v371_v11, -inf  ;;  %v2265_v12 = vld [vmem:[#allocation2 + $0x98] ss:$0 sm:$0xff] }
 0x494   :  { %378 = vmax.xlane.f32.xlu1 %v377_v14 }
 0x495   :  { %v374_v16 = vsel %vm290_vm4, %v366_v13, -inf }
 0x496   :  { %375 = vmax.xlane.f32.xlu0 %v374_v16 }
 0x498   :  { %v2476_v17 = vpop.f32.mrf.mxu1 }
 0x499   :  { %v571_v21 = vadd.f32 %v2476_v17, %v2862_v9 }
 0x49a   :  { %v565_v19 = vpop.f32.mrf.mxu1 }
 0x49b   :  { %v566_v20 = vadd.f32 %v565_v19, %v2860_v8  ;;  %v577_v23 = vsel %vm290_vm4, %v571_v21, -inf }
 0x49d   :  { %v574_v22 = vsel %vm290_vm4, %v566_v20, -inf }
 0x49e   :  { %575 = vmax.xlane.f32.xlu0 %v574_v22 }
 0x4a2   :  { %578 = vmax.xlane.f32.xlu0 %v577_v23 }
 0x4a5   :  { %398 = vrot.lane.b32.xlu1 %v2826_v63, %s2772_s21 }
 0x51d   :  { %v379_v24 = vpop.xlane.xlu1 %378 }
 0x51e   :  { %v381_v25 = vsub.f32 %v371_v11, %v379_v24 }
 0x51f   :  { %v376_v26 = vpop.xlane.xlu0 %375 }
 0x520   :  { %v384_v27 = vmul.f32 1.442695, %v381_v25  ;;  %v380_v28 = vsub.f32 %v366_v13, %v376_v26 }
 0x521   :  { %v399_v29 = vpop.permute.xlu1 %398 }
 0x522   :  { %2659 = vpow2.f32 %v384_v27  ;;  %v382_v30 = vmul.f32 1.442695, %v380_v28  ;;  %2463 = vmatprep.subr.mxu0 %v399_v29 }
 0x523   :  { %2464 = vmatpush3.msra.mxu0 %v399_v29 }
 0x524   :  { %2661 = vpow2.f32 %v382_v30 }
 0x527   :  { %v576_v31 = vpop.xlane.xlu0 %575 }
 0x528   :  { %v580_v41 = vsub.f32 %v566_v20, %v576_v31 }
 0x52a   :  { %v582_v42 = vmul.f32 1.442695, %v580_v41 }
 0x52b   :  { %v579_v32 = vpop.xlane.xlu0 %578 }
 0x52c   :  { %v581_v33 = vsub.f32 %v571_v21, %v579_v32  ;;  %v828_v32 = vld [vmem:[#allocation2 + $0xc8] sm:$0xff] }
 0x52d   :  { %2495 = vmatprep.subr.mxu1 %v828_v32 }
 0x52e   :  { %v584_v34 = vmul.f32 1.442695, %v581_v33  ;;  %2496 = vmatpush3.msra.mxu1 %v828_v32  ;;  %v826_v33 = vld [vmem:[#allocation2 + $0xb8] sm:$0xff] }
 0x52f   :  { %v2660_v35 = vpop.eup %2659 }
 0x530   :  { %2663 = vpow2.f32 %v584_v34  ;;  %v389_v36 = vsel %vm290_vm4, %v2660_v35, 0.0  ;;  %v825_v34 = vld [vmem:[#allocation2 + $0xb0] sm:$0xff] }
 0x531   :  { %v2662_v37 = vpop.eup %2661  ;;  %390 = vadd.xlane.f32.xlu0 %v389_v36  ;;  %2665 = vpow2.f32 %v582_v42  ;;  %v2268_v42 = vld [vmem:[#allocation2 + $0xa0] ss:$0 sm:$0xff] }
 0x532   :  { %v386_v38 = vsel %vm290_vm4, %v2662_v37, 0.0 }
 0x533   :  { %387 = vadd.xlane.f32.xlu1 %v386_v38 }
 0x53d   :  { %v2664_v39 = vpop.eup %2663 }
 0x53e   :  { %v589_v40 = vsel %vm290_vm4, %v2664_v39, 0.0  ;;  %v2666_v43 = vpop.eup %2665 }
 0x53f   :  { %590 = vadd.xlane.f32.xlu0 %v589_v40  ;;  %v586_v44 = vsel %vm290_vm4, %v2666_v43, 0.0 }
 0x544   :  { %598 = vrot.lane.b32.xlu1 %v2826_v63, %s2773_s22  ;;  %v695_v63 = vld [vmem:[#allocation2 + $0x88] sm:$0xff] }
 0x555   :  { %396 = vrot.lane.b32.xlu0 %v2828_v3, %s2772_s21 }
 0x568   :  { %587 = vadd.xlane.f32.xlu1 %v586_v44  ;;  %v2269_v44 = vld [vmem:[#allocation2 + $0xa8] ss:$0 sm:$0xff] }
 0x579   :  { %596 = vrot.lane.b32.xlu1 %v2828_v3, %s2773_s22  ;;  %v693_v3 = vld [vmem:[#allocation2 + $0x78] sm:$0xff] }
 0x5ba   :  { %v391_v45 = vpop.xlane.xlu0 %390 }
 0x5bb   :  { %2667 = vrcp.f32 %v391_v45 }
 0x5bc   :  { %v388_v46 = vpop.xlane.xlu1 %387 }
 0x5bd   :  { %2669 = vrcp.f32 %v388_v46 }
 0x5c0   :  { %v599_v53 = vpop.permute.xlu1 %598 }
 0x5c8   :  { %v591_v47 = vpop.xlane.xlu0 %590  ;;  %v2668_v48 = vpop.eup %2667 }
 0x5c9   :  { %v395_v52 = vmul.f32 %v2668_v48, %v2660_v35  ;;  %2671 = vrcp.f32 %v591_v47 }
 0x5ca   :  { %v2670_v49 = vpop.eup %2669 }
 0x5cb   :  { %v394_v50 = vmul.f32 %v2670_v49, %v2662_v37 }
 0x5cc   :  { %v397_v51 = vpop.permute.xlu0 %396 }
 0x5cd   :  { %2465 = vmatprep.subr.mxu0 %v397_v51  ;;  %2467 = vmatprep.mubr.msk.f32.mxu0 %vm290_vm4, %v394_v50 }
 0x5ce   :  { %2466 = vmatpush3.msra.mxu0 %v397_v51  ;;  %v940_v51 = vld [vmem:[#allocation2 + $0x110] sm:$0xff] }
 0x5cf   :  { %2468 = vmatmul.mubr.msk.f32.vlgmr.msra.gmra.mxu0 %vm290_vm4, %v395_v52  ;;  %2477 = vmatprep.subr.mxu0 %v599_v53  ;;  %v939_v52 = vld [vmem:[#allocation2 + $0x108] sm:$0xff] }
 0x5d0   :  { %2478 = vmatpush3.msra.mxu0 %v599_v53  ;;  %v938_v53 = vld [vmem:[#allocation2 + $0x100] sm:$0xff] }
 0x5d6   :  { %v2672_v57 = vpop.eup %2671 }
 0x5d7   :  { %v595_v61 = vmul.f32 %v2672_v57, %v2664_v39  ;;  %v935_v57 = vld [vmem:[#allocation2 + $0xe8] sm:$0xff] }
 0x5f1   :  { %v588_v54 = vpop.xlane.xlu1 %587 }
 0x5f2   :  { %2673 = vrcp.f32 %v588_v54  ;;  %v937_v54 = vld [vmem:[#allocation2 + $0xf8] sm:$0xff] }
 0x5f5   :  { %v597_v55 = vpop.permute.xlu1 %596 }
 0x5f6   :  { %2479 = vmatprep.subr.mxu0 %v597_v55 }
 0x5f7   :  { %2480 = vmatpush3.msra.mxu0 %v597_v55  ;;  %v936_v55 = vld [vmem:[#allocation2 + $0xf0] sm:$0xff] }
 0x5f8   :  { %2484 = vmatprep.subr.mxu0 %v696_v62 }
 0x5ff   :  { %v2674_v58 = vpop.eup %2673 }
 0x600   :  { %v594_v59 = vmul.f32 %v2674_v58, %v2666_v43  ;;  %v934_v58 = vld [vmem:[#allocation2 + $0xe0] sm:$0xff] }
 0x602   :  { %2481 = vmatprep.mubr.msk.f32.mxu0 %vm290_vm4, %v594_v59  ;;  %v933_v59 = vld [vmem:[#allocation2 + $0xd8] sm:$0xff] }
 0x603   :  { %2482 = vmatmul.mubr.msk.f32.vlgmr.msra.gmra.mxu0 %vm290_vm4, %v595_v61  ;;  %v2270_v61 = vld [vmem:[#allocation2 + $0xd0] ss:$0 sm:$0xff] }
 0x604   :  { %2485 = vmatpush3.msra.mxu0 %v696_v62 }
 0x605   :  { %2486 = vmatprep.subr.mxu0 %v695_v63 }
 0x606   :  { %2487 = vmatpush3.msra.mxu0 %v695_v63 }
 0x607   :  { %2488 = vmatprep.subr.mxu0 %v694_v0 }
 0x608   :  { %2489 = vmatpush3.msra.mxu0 %v694_v0 }
 0x609   :  { %2490 = vmatprep.subr.mxu0 %v693_v3 }
 0x60a   :  { %2491 = vmatpush3.msra.mxu0 %v693_v3 }
 0x60b   :  { %2506 = vmatprep.subr.mxu0 %v940_v51 }
 0x68f   :  { %v2469_v4 = vpop.f32.mrf.mxu0 }
 0x691   :  { %v474_v5 = vpop.f32.mrf.mxu0 }
 0x6c3   :  { %v2483_v6 = vpop.f32.mrf.mxu0 }
 0x6c4   :  { %687 = vrot.lane.b32.xlu1 %v2483_v6, %s2774_s23 }
 0x6c5   :  { %v674_v7 = vpop.f32.mrf.mxu0 }
 0x6c6   :  { %685 = vrot.lane.b32.xlu0 %v674_v7, %s2774_s23 }
 0x736   :  { %v688_v1 = vpop.permute.xlu1 %687 }
 0x737   :  { %v692_v11 = vsel %vm290_vm4, %v2469_v4, %v688_v1 }
 0x738   :  { %v686_v2 = vpop.permute.xlu0 %685 }
 0x739   :  { %v691_v10 = vsel %vm290_vm4, %v474_v5, %v686_v2 }
 0x73a   :  { %2492 = vmatprep.mubr.msk.f32.mxu0 %vm136_vm3, %v691_v10 }
 0x73b   :  { %2493 = vmatmul.mubr.msk.f32.vlgmr.msra.gmra.mxu0 %vm136_vm3, %v692_v11 }
 0x73c   :  { %2507 = vmatpush3.msra.mxu0 %v940_v51 }
 0x73d   :  { %2508 = vmatprep.subr.mxu0 %v939_v52 }
 0x73e   :  { %2509 = vmatpush3.msra.mxu0 %v939_v52  ;;  %v2276_v52 = vld [vmem:[#allocation2 + $0x120] ss:$0 sm:$0xff] }
 0x73f   :  { %2510 = vmatprep.subr.mxu0 %v938_v53 }
 0x740   :  { %2511 = vmatpush3.msra.mxu0 %v938_v53 }
 0x741   :  { %2512 = vmatprep.subr.mxu0 %v937_v54 }
 0x742   :  { %2513 = vmatpush3.msra.mxu0 %v937_v54 }
 0x743   :  { %2514 = vmatprep.subr.mxu0 %v936_v55 }
 0x744   :  { %2515 = vmatpush3.msra.mxu0 %v936_v55 }
 0x745   :  { %2516 = vmatprep.subr.mxu0 %v935_v57 }
 0x746   :  { %2517 = vmatpush3.msra.mxu0 %v935_v57 }
 0x747   :  { %2518 = vmatprep.subr.mxu0 %v934_v58 }
 0x748   :  { %2519 = vmatpush3.msra.mxu0 %v934_v58  ;;  %v2277_v58 = vld [vmem:[#allocation2 + $0x128] ss:$0 sm:$0xff] }
 0x749   :  { %2520 = vmatprep.subr.mxu0 %v933_v59 }
 0x74a   :  { %2521 = vmatpush3.msra.mxu0 %v933_v59 }
 0x7fb   :  { %v2494_v13 = vpop.f32.mrf.mxu0 }
 0x7fc   :  { %v780_v14 = vadd.f32 %v2494_v13, %v2265_v12 }
 0x7fd   :  { %v774_v16 = vpop.f32.mrf.mxu0 }
 0x7fe   :  { %v775_v17 = vadd.f32 %v2265_v12, %v774_v16  ;;  %v784_v19 = vadd.f32 %v780_v14, %v2822_v60 }
 0x800   :  { %v790_v20 = vsel %vm136_vm3, %v784_v19, 0.0  ;;  %v783_v21 = vadd.f32 %v775_v17, %v2818_v56  ;;  %v827_v56 = vld [vmem:[#allocation2 + $0xc0] sm:$0xff] }
 0x801   :  { %791 = vadd.xlane.f32.xlu1 %v790_v20  ;;  %2497 = vmatprep.subr.mxu1 %v827_v56 }
 0x802   :  { %v787_v22 = vsel %vm136_vm3, %v783_v21, 0.0  ;;  %2498 = vmatpush3.msra.mxu1 %v827_v56 }
 0x803   :  { %788 = vadd.xlane.f32.xlu0 %v787_v22  ;;  %2499 = vmatprep.subr.mxu1 %v826_v33 }
 0x804   :  { %2500 = vmatpush3.msra.mxu1 %v826_v33 }
 0x805   :  { %2501 = vmatprep.subr.mxu1 %v825_v34 }
 0x806   :  { %2502 = vmatpush3.msra.mxu1 %v825_v34 }
 0x88a   :  { %v792_v23 = vpop.xlane.xlu1 %791 }
 0x88b   :  { %v794_v24 = vmul.f32 0.03125, %v792_v23 }
 0x88c   :  { %v789_v25 = vpop.xlane.xlu0 %788 }
 0x88d   :  { %v793_v26 = vmul.f32 0.03125, %v789_v25  ;;  %v796_v27 = vsub.f32 %v784_v19, %v794_v24  ;;  %v2273_v24 = vld [vmem:[#allocation2 + $0x118] ss:$0 sm:$0xff] }
 0x88f   :  { %v795_v28 = vsub.f32 %v783_v21, %v793_v26  ;;  %v798_v31 = vmul.f32 %v796_v27, %v796_v27 }
 0x891   :  { %v797_v29 = vmul.f32 %v795_v28, %v795_v28  ;;  %v802_v60 = vsel %vm136_vm3, %v798_v31, 0.0 }
 0x893   :  { %v799_v30 = vsel %vm136_vm3, %v797_v29, 0.0 }
 0x894   :  { %800 = vadd.xlane.f32.xlu0 %v799_v30 }
 0x898   :  { %803 = vadd.xlane.f32.xlu0 %v802_v60 }
 0x91d   :  { %v801_v35 = vpop.xlane.xlu0 %800 }
 0x91e   :  { %v805_v36 = vmul.f32 0.03125, %v801_v35 }
 0x920   :  { %v807_v37 = vadd.f32 1e-07, %v805_v36 }
 0x921   :  { %v804_v38 = vpop.xlane.xlu0 %803 }
 0x922   :  { %2675 = vrsqrt.f32 %v807_v37  ;;  %v806_v39 = vmul.f32 0.03125, %v804_v38 }
 0x924   :  { %v808_v40 = vadd.f32 1e-07, %v806_v39 }
 0x926   :  { %2677 = vrsqrt.f32 %v808_v40 }
 0x92f   :  { %v2676_v41 = vpop.eup %2675 }
 0x930   :  { %v811_v43 = vmul.f32 %v2676_v41, %v795_v28  ;;  %v1072_v41 = vld [vmem:[#allocation2 + $0x148] sm:$0xff] }
 0x931   :  { %2525 = vmatprep.subr.mxu1 %v1072_v41 }
 0x932   :  { %v817_v45 = vmul.f32 %v2268_v42, %v811_v43  ;;  %v1070_v43 = vld [vmem:[#allocation2 + $0x138] sm:$0xff] }
 0x933   :  { %v2678_v46 = vpop.eup %2677 }
 0x934   :  { %v812_v47 = vmul.f32 %v2678_v46, %v796_v27  ;;  %v2900_v48 = vadd.f32 %v2269_v44, %v817_v45 }
 0x936   :  { %v818_v49 = vmul.f32 %v2268_v42, %v812_v47  ;;  %2503 = vmatprep.mubr.msk.f32.mxu1 %vm136_vm3, %v2900_v48  ;;  %v1071_v42 = vld [vmem:[#allocation2 + $0x140] sm:$0xff] }
 0x938   :  { %v824_v50 = vadd.f32 %v2269_v44, %v818_v49  ;;  %v1069_v44 = vld [vmem:[#allocation2 + $0x130] sm:$0xff] }
 0x93a   :  { %2504 = vmatmul.mubr.msk.f32.vlgmr.msra.gmra.mxu1 %vm136_vm3, %v824_v50 }
 0x93b   :  { %2526 = vmatpush3.msra.mxu1 %v1072_v41 }
 0x93c   :  { %2527 = vmatprep.subr.mxu1 %v1071_v42 }
 0x93d   :  { %2528 = vmatpush3.msra.mxu1 %v1071_v42 }
 0x93e   :  { %2529 = vmatprep.subr.mxu1 %v1070_v43 }
 0x93f   :  { %2530 = vmatpush3.msra.mxu1 %v1070_v43 }
 0x940   :  { %2531 = vmatprep.subr.mxu1 %v1069_v44 }
 0x941   :  { %2532 = vmatpush3.msra.mxu1 %v1069_v44 }
 0x9fa   :  { %v2505_v62 = vpop.f32.mrf.mxu1 }
 0x9fb   :  { %v912_v63 = vadd.f32 %v2505_v62, %v2270_v61 }
 0x9fc   :  { %v906_v0 = vpop.f32.mrf.mxu1 }
 0x9fd   :  { %v916_v3 = vmul.f32 %v912_v63, %v912_v63  ;;  %v907_v4 = vadd.f32 %v2270_v61, %v906_v0 }
 0x9ff   :  { %v918_v5 = vmul.f32 %v916_v3, %v912_v63  ;;  %v915_v6 = vmul.f32 %v907_v4, %v907_v4 }
 0xa01   :  { %v920_v7 = vmul.f32 0.044715, %v918_v5  ;;  %v917_v1 = vmul.f32 %v915_v6, %v907_v4 }
 0xa03   :  { %v922_v2 = vadd.f32 %v920_v7, %v912_v63  ;;  %v919_v10 = vmul.f32 0.044715, %v917_v1 }
 0xa05   :  { %v924_v11 = vmul.f32 0.7978846, %v922_v2  ;;  %v921_v12 = vadd.f32 %v919_v10, %v907_v4 }
 0xa07   :  { %2679 = vtanh.f32 %v924_v11  ;;  %v923_v13 = vmul.f32 0.7978846, %v921_v12 }
 0xa09   :  { %2681 = vtanh.f32 %v923_v13 }
 0xa14   :  { %v2680_v14 = vpop.eup %2679 }
 0xa15   :  { %v928_v16 = vadd.f32 1.0, %v2680_v14 }
 0xa16   :  { %v2682_v17 = vpop.eup %2681 }
 0xa17   :  { %v927_v19 = vadd.f32 1.0, %v2682_v17  ;;  %v930_v20 = vmul.f32 0.5, %v928_v16 }
 0xa19   :  { %v929_v21 = vmul.f32 0.5, %v927_v19  ;;  %v932_v23 = vmul.f32 %v930_v20, %v912_v63  ;;  %v2278_v63 = vld [vmem:[#allocation2 + $0x150] ss:$0 sm:$0xff] }
 0xa1b   :  { %v931_v22 = vmul.f32 %v929_v21, %v907_v4 }
 0xa1d   :  { %2522 = vmatprep.mubr.msk.f32.mxu0 %vm52_vm0, %v931_v22 }
 0xa1e   :  { %2523 = vmatmul.mubr.msk.f32.vlgmr.msra.gmra.mxu0 %vm52_vm0, %v932_v23 }
 0xade   :  { %v2524_v25 = vpop.f32.mrf.mxu0 }
 0xadf   :  { %v1024_v26 = vadd.f32 %v2524_v25, %v2273_v24 }
 0xae0   :  { %v1018_v27 = vpop.f32.mrf.mxu0 }
 0xae1   :  { %v1019_v28 = vadd.f32 %v2273_v24, %v1018_v27  ;;  %v1028_v29 = vadd.f32 %v1024_v26, %v824_v50 }
 0xae3   :  { %v1034_v30 = vsel %vm136_vm3, %v1028_v29, 0.0  ;;  %v1027_v31 = vadd.f32 %v1019_v28, %v2900_v48 }
 0xae4   :  { %1035 = vadd.xlane.f32.xlu0 %v1034_v30 }
 0xae5   :  { %v1031_v60 = vsel %vm136_vm3, %v1027_v31, 0.0 }
 0xae6   :  { %1032 = vadd.xlane.f32.xlu1 %v1031_v60 }
 0xb6d   :  { %v1036_v32 = vpop.xlane.xlu0 %1035 }
 0xb6e   :  { %v1038_v56 = vmul.f32 0.03125, %v1036_v32 }
 0xb6f   :  { %v1033_v33 = vpop.xlane.xlu1 %1032 }
 0xb70   :  { %v1040_v34 = vsub.f32 %v1028_v29, %v1038_v56  ;;  %v1037_v35 = vmul.f32 0.03125, %v1033_v33 }
 0xb72   :  { %v1039_v36 = vsub.f32 %v1027_v31, %v1037_v35  ;;  %v1042_v37 = vmul.f32 %v1040_v34, %v1040_v34 }
 0xb74   :  { %v1046_v38 = vsel %vm136_vm3, %v1042_v37, 0.0  ;;  %v1041_v39 = vmul.f32 %v1039_v36, %v1039_v36 }
 0xb75   :  { %1047 = vadd.xlane.f32.xlu0 %v1046_v38 }
 0xb76   :  { %v1043_v40 = vsel %vm136_vm3, %v1041_v39, 0.0 }
 0xb77   :  { %1044 = vadd.xlane.f32.xlu1 %v1043_v40 }
 0xbfe   :  { %v1048_v45 = vpop.xlane.xlu0 %1047 }
 0xbff   :  { %v1050_v46 = vmul.f32 0.03125, %v1048_v45 }
 0xc00   :  { %v1045_v47 = vpop.xlane.xlu1 %1044 }
 0xc01   :  { %v1052_v48 = vadd.f32 1e-07, %v1050_v46  ;;  %v1049_v49 = vmul.f32 0.03125, %v1045_v47 }
 0xc03   :  { %2683 = vrsqrt.f32 %v1052_v48  ;;  %v1051_v50 = vadd.f32 1e-07, %v1049_v49 }
 0xc05   :  { %2685 = vrsqrt.f32 %v1051_v50 }
 0xc10   :  { %v2684_v51 = vpop.eup %2683 }
 0xc11   :  { %v1056_v53 = vmul.f32 %v2684_v51, %v1040_v34 }
 0xc12   :  { %v2686_v54 = vpop.eup %2685 }
 0xc13   :  { %v1055_v55 = vmul.f32 %v2686_v54, %v1039_v36  ;;  %v1062_v57 = vmul.f32 %v2276_v52, %v1056_v53 }
 0xc15   :  { %v1061_v59 = vmul.f32 %v2276_v52, %v1055_v55  ;;  %v2914_v62 = vadd.f32 %v2277_v58, %v1062_v57 }
 0xc17   :  { %v2912_v61 = vadd.f32 %v2277_v58, %v1061_v59  ;;  %v1570_v59 = vld [vmem:[#allocation2 + $0x170] sm:$0xff] }
 0xc19   :  { %2533 = vmatprep.mubr.msk.f32.mxu1 %vm136_vm3, %v2912_v61 }
 0xc1a   :  { %2534 = vmatmul.mubr.msk.f32.vlgmr.msra.gmra.mxu1 %vm136_vm3, %v2914_v62 }
 0xcda   :  { %v2535_v0 = vpop.f32.mrf.mxu1 }
 0xcdb   :  { %v2920_v3 = vadd.f32 %v2535_v0, %v2278_v63  ;;  %v1568_v0 = vld [vmem:[#allocation2 + $0x160] sm:$0xff] }
 0xcdc   :  { %v1150_v4 = vpop.f32.mrf.mxu1 }
 0xcdd   :  { %v2922_v5 = vadd.f32 %v2278_v63, %v1150_v4  ;;  %1163 = vrot.lane.b32.xlu1 %v2920_v3, %s2770_s1  ;;  %v1569_v63 = vld [vmem:[#allocation2 + $0x168] sm:$0xff] }
 0xcdf   :  { %1161 = vrot.lane.b32.xlu0 %v2922_v5, %s2770_s1  ;;  %2540 = vmatprep.mubr.msk.f32.mxu1 %vm290_vm4, %v2922_v5 }
 0xce1   :  { %1363 = vrot.lane.b32.xlu1 %v2920_v3, %s2769_s0 }
 0xce3   :  { %1357 = vrot.lane.b32.xlu0 %v2922_v5, %s2771_s20 }
 0xce5   :  { %1361 = vrot.lane.b32.xlu1 %v2922_v5, %s2769_s0 }
 0xce9   :  { %1359 = vrot.lane.b32.xlu1 %v2920_v3, %s2771_s20 }
 0xd4f   :  { %v1164_v6 = vpop.permute.xlu1 %1163 }
 0xd50   :  { %2536 = vmatprep.subr.msk.mxu1 %vm290_vm4, %v1164_v6 }
 0xd51   :  { %2537 = vmatpush3.xpose.msk.msra.mxu1 %vm290_vm4, %v1164_v6  ;;  %v1162_v7 = vpop.permute.xlu0 %1161 }
 0xd52   :  { %2538 = vmatprep.subr.msk.mxu1 %vm290_vm4, %v1162_v7 }
 0xd53   :  { %v1364_v1 = vpop.permute.xlu1 %1363 }
 0xd55   :  { %2539 = vmatpush3.xpose.msk.msra.mxu1 %vm290_vm4, %v1162_v7  ;;  %v1358_v2 = vpop.permute.xlu0 %1357 }
 0xd56   :  { %2550 = vmatprep.subr.msk.mxu1 %vm290_vm4, %v1364_v1 }
 0xd57   :  { %v1362_v10 = vpop.permute.xlu1 %1361 }
 0xd58   :  { %2541 = vmatmul.mubr.msk.f32.vlgmr.msra.gmra.mxu1 %vm290_vm4, %v2920_v3 }
 0xd59   :  { %2551 = vmatpush3.xpose.msk.msra.mxu1 %vm290_vm4, %v1364_v1  ;;  %2554 = vmatprep.mubr.msk.f32.mxu1 %vm290_vm4, %v1358_v2 }
 0xd5a   :  { %2552 = vmatprep.subr.msk.mxu1 %vm290_vm4, %v1362_v10 }
 0xd5b   :  { %v1360_v11 = vpop.permute.xlu1 %1359 }
 0xd5d   :  { %2553 = vmatpush3.xpose.msk.msra.mxu1 %vm290_vm4, %v1362_v10 }
 0xd60   :  { %2555 = vmatmul.mubr.msk.f32.vlgmr.msra.gmra.mxu1 %vm290_vm4, %v1360_v11 }
 0xe18   :  { %v2542_v12 = vpop.f32.mrf.mxu1 }
 0xe19   :  { %v1245_v13 = vadd.f32 %v2542_v12, %v2862_v9  ;;  %v2293_v12 = vld [vmem:[#allocation2 + $0x178] ss:$0 sm:$0xff] }
 0xe1a   :  { %v1239_v14 = vpop.f32.mrf.mxu1 }
 0xe1b   :  { %v1240_v16 = vadd.f32 %v1239_v14, %v2860_v8  ;;  %v1251_v17 = vsel %vm290_vm4, %v1245_v13, -inf }
 0xe1c   :  { %1252 = vmax.xlane.f32.xlu1 %v1251_v17 }
 0xe1d   :  { %v1248_v19 = vsel %vm290_vm4, %v1240_v16, -inf }
 0xe1e   :  { %1249 = vmax.xlane.f32.xlu0 %v1248_v19 }
 0xe20   :  { %v2556_v20 = vpop.f32.mrf.mxu1 }
 0xe21   :  { %v1445_v23 = vadd.f32 %v2556_v20, %v2862_v9 }
 0xe22   :  { %v1439_v21 = vpop.f32.mrf.mxu1 }
 0xe23   :  { %v1440_v22 = vadd.f32 %v1439_v21, %v2860_v8  ;;  %v1451_v25 = vsel %vm290_vm4, %v1445_v23, -inf }
 0xe25   :  { %v1448_v24 = vsel %vm290_vm4, %v1440_v22, -inf }
 0xe26   :  { %1449 = vmax.xlane.f32.xlu0 %v1448_v24 }
 0xe2a   :  { %1452 = vmax.xlane.f32.xlu0 %v1451_v25 }
 0xe2d   :  { %1272 = vrot.lane.b32.xlu1 %v2920_v3, %s2772_s21 }
 0xea5   :  { %v1253_v26 = vpop.xlane.xlu1 %1252 }
 0xea6   :  { %v1255_v27 = vsub.f32 %v1245_v13, %v1253_v26 }
 0xea7   :  { %v1250_v28 = vpop.xlane.xlu0 %1249 }
 0xea8   :  { %v1258_v29 = vmul.f32 1.442695, %v1255_v27  ;;  %v1254_v30 = vsub.f32 %v1240_v16, %v1250_v28 }
 0xea9   :  { %v1273_v31 = vpop.permute.xlu1 %1272 }
 0xeaa   :  { %2687 = vpow2.f32 %v1258_v29  ;;  %v1256_v60 = vmul.f32 1.442695, %v1254_v30  ;;  %2543 = vmatprep.subr.mxu0 %v1273_v31 }
 0xeab   :  { %2544 = vmatpush3.msra.mxu0 %v1273_v31 }
 0xeac   :  { %2689 = vpow2.f32 %v1256_v60  ;;  %v1702_v60 = vld [vmem:[#allocation2 + $0x1a8] sm:$0xff] }
 0xead   :  { %2575 = vmatprep.subr.mxu1 %v1702_v60 }
 0xeae   :  { %2576 = vmatpush3.msra.mxu1 %v1702_v60 }
 0xeaf   :  { %v1450_v8 = vpop.xlane.xlu0 %1449 }
 0xeb0   :  { %v1454_v39 = vsub.f32 %v1440_v22, %v1450_v8  ;;  %v1700_v8 = vld [vmem:[#allocation2 + $0x198] sm:$0xff] }
 0xeb2   :  { %v1456_v40 = vmul.f32 1.442695, %v1454_v39 }
 0xeb3   :  { %v1453_v9 = vpop.xlane.xlu0 %1452 }
 0xeb4   :  { %v1455_v32 = vsub.f32 %v1445_v23, %v1453_v9  ;;  %v1699_v9 = vld [vmem:[#allocation2 + $0x190] sm:$0xff] }
 0xeb6   :  { %v1458_v56 = vmul.f32 1.442695, %v1455_v32 }
 0xeb7   :  { %v2688_v33 = vpop.eup %2687 }
 0xeb8   :  { %2691 = vpow2.f32 %v1458_v56  ;;  %v1263_v34 = vsel %vm290_vm4, %v2688_v33, 0.0 }
 0xeb9   :  { %v2690_v35 = vpop.eup %2689  ;;  %1264 = vadd.xlane.f32.xlu0 %v1263_v34  ;;  %2693 = vpow2.f32 %v1456_v40  ;;  %v2297_v40 = vld [vmem:[#allocation2 + $0x188] ss:$0 sm:$0xff] }
 0xeba   :  { %v1260_v36 = vsel %vm290_vm4, %v2690_v35, 0.0 }
 0xebb   :  { %1261 = vadd.xlane.f32.xlu1 %v1260_v36 }
 0xec5   :  { %v2692_v37 = vpop.eup %2691 }
 0xec6   :  { %v1463_v38 = vsel %vm290_vm4, %v2692_v37, 0.0  ;;  %v2694_v41 = vpop.eup %2693 }
 0xec7   :  { %1464 = vadd.xlane.f32.xlu0 %v1463_v38  ;;  %v1460_v42 = vsel %vm290_vm4, %v2694_v41, 0.0  ;;  %v2296_v38 = vld [vmem:[#allocation2 + $0x180] ss:$0 sm:$0xff] }
 0xecc   :  { %1472 = vrot.lane.b32.xlu1 %v2920_v3, %s2773_s22  ;;  %v1567_v3 = vld [vmem:[#allocation2 + $0x158] sm:$0xff] }
 0xedd   :  { %1270 = vrot.lane.b32.xlu0 %v2922_v5, %s2772_s21 }
 0xef0   :  { %1461 = vadd.xlane.f32.xlu1 %v1460_v42 }
 0xf01   :  { %1470 = vrot.lane.b32.xlu1 %v2922_v5, %s2773_s22 }
 0xf42   :  { %v1265_v43 = vpop.xlane.xlu0 %1264 }
 0xf43   :  { %2695 = vrcp.f32 %v1265_v43 }
 0xf44   :  { %v1262_v44 = vpop.xlane.xlu1 %1261 }
 0xf45   :  { %2697 = vrcp.f32 %v1262_v44 }
 0xf48   :  { %v1473_v51 = vpop.permute.xlu1 %1472 }
 0xf50   :  { %v1465_v45 = vpop.xlane.xlu0 %1464  ;;  %v2696_v46 = vpop.eup %2695 }
 0xf51   :  { %v1269_v50 = vmul.f32 %v2696_v46, %v2688_v33  ;;  %2699 = vrcp.f32 %v1465_v45 }
 0xf52   :  { %v2698_v47 = vpop.eup %2697 }
 0xf53   :  { %v1268_v48 = vmul.f32 %v2698_v47, %v2690_v35  ;;  %v1814_v47 = vld [vmem:[#allocation2 + $0x1f0] sm:$0xff] }
 0xf54   :  { %v1271_v49 = vpop.permute.xlu0 %1270 }
 0xf55   :  { %2545 = vmatprep.subr.mxu0 %v1271_v49  ;;  %2547 = vmatprep.mubr.msk.f32.mxu0 %vm290_vm4, %v1268_v48  ;;  %v1813_v48 = vld [vmem:[#allocation2 + $0x1e8] sm:$0xff] }
 0xf56   :  { %2546 = vmatpush3.msra.mxu0 %v1271_v49  ;;  %v1812_v49 = vld [vmem:[#allocation2 + $0x1e0] sm:$0xff] }
 0xf57   :  { %2548 = vmatmul.mubr.msk.f32.vlgmr.msra.gmra.mxu0 %vm290_vm4, %v1269_v50  ;;  %2557 = vmatprep.subr.mxu0 %v1473_v51  ;;  %v1811_v50 = vld [vmem:[#allocation2 + $0x1d8] sm:$0xff] }
 0xf58   :  { %2558 = vmatpush3.msra.mxu0 %v1473_v51  ;;  %v1810_v51 = vld [vmem:[#allocation2 + $0x1d0] sm:$0xff] }
 0xf5e   :  { %v2700_v54 = vpop.eup %2699 }
 0xf5f   :  { %v1469_v58 = vmul.f32 %v2700_v54, %v2692_v37  ;;  %v1807_v54 = vld [vmem:[#allocation2 + $0x1b8] sm:$0xff] }
 0xf79   :  { %v1462_v52 = vpop.xlane.xlu1 %1461 }
 0xf7a   :  { %2701 = vrcp.f32 %v1462_v52  ;;  %v1809_v52 = vld [vmem:[#allocation2 + $0x1c8] sm:$0xff] }
 0xf7d   :  { %v1471_v53 = vpop.permute.xlu1 %1470 }
 0xf7e   :  { %2559 = vmatprep.subr.mxu0 %v1471_v53 }
 0xf7f   :  { %2560 = vmatpush3.msra.mxu0 %v1471_v53  ;;  %v1808_v53 = vld [vmem:[#allocation2 + $0x1c0] sm:$0xff] }
 0xf80   :  { %2564 = vmatprep.subr.mxu0 %v1570_v59 }
 0xf87   :  { %v2702_v55 = vpop.eup %2701 }
 0xf88   :  { %v1468_v57 = vmul.f32 %v2702_v55, %v2694_v41  ;;  %v2298_v55 = vld [vmem:[#allocation2 + $0x1b0] ss:$0 sm:$0xff] }
 0xf8a   :  { %2561 = vmatprep.mubr.msk.f32.mxu0 %vm290_vm4, %v1468_v57 }
 0xf8b   :  { %2562 = vmatmul.mubr.msk.f32.vlgmr.msra.gmra.mxu0 %vm290_vm4, %v1469_v58 }
 0xf8c   :  { %2565 = vmatpush3.msra.mxu0 %v1570_v59 }
 0xf8d   :  { %2566 = vmatprep.subr.mxu0 %v1569_v63 }
 0xf8e   :  { %2567 = vmatpush3.msra.mxu0 %v1569_v63 }
 0xf8f   :  { %2568 = vmatprep.subr.mxu0 %v1568_v0 }
 0xf90   :  { %2569 = vmatpush3.msra.mxu0 %v1568_v0 }
 0xf91   :  { %2570 = vmatprep.subr.mxu0 %v1567_v3 }
 0xf92   :  { %2571 = vmatpush3.msra.mxu0 %v1567_v3 }
 0xf93   :  { %2586 = vmatprep.subr.mxu0 %v1814_v47 }
0x1017   :  { %v2549_v4 = vpop.f32.mrf.mxu0 }
0x1019   :  { %v1348_v5 = vpop.f32.mrf.mxu0 }
0x104b   :  { %v2563_v6 = vpop.f32.mrf.mxu0 }
0x104c   :  { %1561 = vrot.lane.b32.xlu1 %v2563_v6, %s2774_s23 }
0x104d   :  { %v1548_v7 = vpop.f32.mrf.mxu0 }
0x104e   :  { %1559 = vrot.lane.b32.xlu0 %v1548_v7, %s2774_s23 }
0x10be   :  { %v1562_v1 = vpop.permute.xlu1 %1561 }
0x10bf   :  { %v1566_v11 = vsel %vm290_vm4, %v2549_v4, %v1562_v1 }
0x10c0   :  { %v1560_v2 = vpop.permute.xlu0 %1559 }
0x10c1   :  { %v1565_v10 = vsel %vm290_vm4, %v1348_v5, %v1560_v2 }
0x10c2   :  { %2572 = vmatprep.mubr.msk.f32.mxu0 %vm136_vm3, %v1565_v10 }
0x10c3   :  { %2573 = vmatmul.mubr.msk.f32.vlgmr.msra.gmra.mxu0 %vm136_vm3, %v1566_v11 }
0x10c4   :  { %2587 = vmatpush3.msra.mxu0 %v1814_v47 }
0x10c5   :  { %2588 = vmatprep.subr.mxu0 %v1813_v48 }
0x10c6   :  { %2589 = vmatpush3.msra.mxu0 %v1813_v48 }
0x10c7   :  { %2590 = vmatprep.subr.mxu0 %v1812_v49 }
0x10c8   :  { %2591 = vmatpush3.msra.mxu0 %v1812_v49  ;;  %v2305_v49 = vld [vmem:[#allocation2 + $0x208] ss:$0 sm:$0xff] }
0x10c9   :  { %2592 = vmatprep.subr.mxu0 %v1811_v50 }
0x10ca   :  { %2593 = vmatpush3.msra.mxu0 %v1811_v50 }
0x10cb   :  { %2594 = vmatprep.subr.mxu0 %v1810_v51 }
0x10cc   :  { %2595 = vmatpush3.msra.mxu0 %v1810_v51 }
0x10cd   :  { %2596 = vmatprep.subr.mxu0 %v1809_v52 }
0x10ce   :  { %2597 = vmatpush3.msra.mxu0 %v1809_v52 }
0x10cf   :  { %2598 = vmatprep.subr.mxu0 %v1808_v53 }
0x10d0   :  { %2599 = vmatpush3.msra.mxu0 %v1808_v53 }
0x10d1   :  { %2600 = vmatprep.subr.mxu0 %v1807_v54 }
0x10d2   :  { %2601 = vmatpush3.msra.mxu0 %v1807_v54 }
0x10d3   :  { %2627 = vmatprep.subr.mxu0 %v2767_v18 }
0x1183   :  { %v2574_v13 = vpop.f32.mrf.mxu0 }
0x1184   :  { %v1654_v14 = vadd.f32 %v2574_v13, %v2293_v12 }
0x1185   :  { %v1648_v16 = vpop.f32.mrf.mxu0 }
0x1186   :  { %v1649_v17 = vadd.f32 %v2293_v12, %v1648_v16  ;;  %v1658_v19 = vadd.f32 %v1654_v14, %v2914_v62 }
0x1188   :  { %v1664_v20 = vsel %vm136_vm3, %v1658_v19, 0.0  ;;  %v1657_v21 = vadd.f32 %v1649_v17, %v2912_v61  ;;  %v1701_v61 = vld [vmem:[#allocation2 + $0x1a0] sm:$0xff] }
0x1189   :  { %1665 = vadd.xlane.f32.xlu1 %v1664_v20  ;;  %2577 = vmatprep.subr.mxu1 %v1701_v61 }
0x118a   :  { %v1661_v22 = vsel %vm136_vm3, %v1657_v21, 0.0  ;;  %2578 = vmatpush3.msra.mxu1 %v1701_v61 }
0x118b   :  { %1662 = vadd.xlane.f32.xlu0 %v1661_v22  ;;  %2579 = vmatprep.subr.mxu1 %v1700_v8  ;;  %v2301_v22 = vld [vmem:[#allocation2 + $0x1f8] ss:$0 sm:$0xff] }
0x118c   :  { %2580 = vmatpush3.msra.mxu1 %v1700_v8 }
0x118d   :  { %2581 = vmatprep.subr.mxu1 %v1699_v9 }
0x118e   :  { %2582 = vmatpush3.msra.mxu1 %v1699_v9 }
0x118f   :  { %2605 = vmatprep.subr.mxu1 %v2767_v18 }
0x1212   :  { %v1666_v23 = vpop.xlane.xlu1 %1665 }
0x1213   :  { %v1668_v24 = vmul.f32 0.03125, %v1666_v23 }
0x1214   :  { %v1663_v25 = vpop.xlane.xlu0 %1662 }
0x1215   :  { %v1667_v26 = vmul.f32 0.03125, %v1663_v25  ;;  %v1670_v27 = vsub.f32 %v1658_v19, %v1668_v24 }
0x1217   :  { %v1669_v28 = vsub.f32 %v1657_v21, %v1667_v26  ;;  %v1672_v31 = vmul.f32 %v1670_v27, %v1670_v27 }
0x1219   :  { %v1671_v29 = vmul.f32 %v1669_v28, %v1669_v28  ;;  %v1676_v62 = vsel %vm136_vm3, %v1672_v31, 0.0 }
0x121b   :  { %v1673_v30 = vsel %vm136_vm3, %v1671_v29, 0.0 }
0x121c   :  { %1674 = vadd.xlane.f32.xlu0 %v1673_v30 }
0x1220   :  { %1677 = vadd.xlane.f32.xlu0 %v1676_v62 }
0x12a5   :  { %v1675_v32 = vpop.xlane.xlu0 %1674 }
0x12a6   :  { %v1679_v56 = vmul.f32 0.03125, %v1675_v32 }
0x12a8   :  { %v1681_v33 = vadd.f32 1e-07, %v1679_v56 }
0x12a9   :  { %v1678_v34 = vpop.xlane.xlu0 %1677 }
0x12aa   :  { %2703 = vrsqrt.f32 %v1681_v33  ;;  %v1680_v35 = vmul.f32 0.03125, %v1678_v34 }
0x12ac   :  { %v1682_v36 = vadd.f32 1e-07, %v1680_v35  ;;  %v1951_v35 = vld [vmem:[#allocation2 + $0x228] sm:$0xff] }
0x12ae   :  { %2705 = vrsqrt.f32 %v1682_v36  ;;  %v1950_v36 = vld [vmem:[#allocation2 + $0x220] sm:$0xff] }
0x12b7   :  { %v2704_v37 = vpop.eup %2703 }
0x12b8   :  { %v1685_v39 = vmul.f32 %v2704_v37, %v1669_v28  ;;  %v1949_v37 = vld [vmem:[#allocation2 + $0x218] sm:$0xff] }
0x12ba   :  { %v1691_v41 = vmul.f32 %v2296_v38, %v1685_v39 }
0x12bb   :  { %v2706_v42 = vpop.eup %2705 }
0x12bc   :  { %v1686_v43 = vmul.f32 %v2706_v42, %v1670_v27  ;;  %v2987_v44 = vadd.f32 %v2297_v40, %v1691_v41 }
0x12be   :  { %v1692_v45 = vmul.f32 %v2296_v38, %v1686_v43  ;;  %2583 = vmatprep.mubr.msk.f32.mxu1 %vm136_vm3, %v2987_v44  ;;  %v1948_v38 = vld [vmem:[#allocation2 + $0x210] sm:$0xff] }
0x12c0   :  { %v1698_v46 = vadd.f32 %v2297_v40, %v1692_v45 }
0x12c2   :  { %2584 = vmatmul.mubr.msk.f32.vlgmr.msra.gmra.mxu1 %vm136_vm3, %v1698_v46 }
0x12c3   :  { %2606 = vmatpush3.msra.mxu1 %v1951_v35  ;;  %2613 = vmatprep.mubr.msk.f32.mxu1 %vm2775_vm5, %v2767_v18 }
0x12c4   :  { %2607 = vmatprep.subr.mxu1 %v2767_v18 }
0x12c5   :  { %2608 = vmatpush3.msra.mxu1 %v1950_v36 }
0x12c6   :  { %2609 = vmatprep.subr.mxu1 %v2767_v18 }
0x12c7   :  { %2610 = vmatpush3.msra.mxu1 %v1949_v37 }
0x12c8   :  { %2611 = vmatprep.subr.mxu1 %v2767_v18 }
0x12c9   :  { %2612 = vmatpush3.msra.mxu1 %v1948_v38 }
0x12ca   :  { %2616 = vmatprep.subr.mxu1 %v2767_v18 }
0x1382   :  { %v2585_v57 = vpop.f32.mrf.mxu1 }
0x1383   :  { %v1786_v58 = vadd.f32 %v2585_v57, %v2298_v55 }
0x1384   :  { %v1780_v59 = vpop.f32.mrf.mxu1 }
0x1385   :  { %v1790_v63 = vmul.f32 %v1786_v58, %v1786_v58  ;;  %v1781_v0 = vadd.f32 %v2298_v55, %v1780_v59  ;;  %v2041_v59 = vld [vmem:[#allocation2 + $0x248] sm:$0xff] }
0x1387   :  { %v1792_v3 = vmul.f32 %v1790_v63, %v1786_v58  ;;  %v1789_v4 = vmul.f32 %v1781_v0, %v1781_v0  ;;  %v2040_v63 = vld [vmem:[#allocation2 + $0x240] sm:$0xff] }
0x1389   :  { %v1794_v5 = vmul.f32 0.044715, %v1792_v3  ;;  %v1791_v6 = vmul.f32 %v1789_v4, %v1781_v0  ;;  %v2306_v3 = vld [vmem:[#allocation2 + $0x230] ss:$0 sm:$0xff] }
0x138b   :  { %v1796_v7 = vadd.f32 %v1794_v5, %v1786_v58  ;;  %v1793_v1 = vmul.f32 0.044715, %v1791_v6 }
0x138d   :  { %v1798_v2 = vmul.f32 0.7978846, %v1796_v7  ;;  %v1795_v10 = vadd.f32 %v1793_v1, %v1781_v0 }
0x138f   :  { %2707 = vtanh.f32 %v1798_v2  ;;  %v1797_v11 = vmul.f32 0.7978846, %v1795_v10 }
0x1391   :  { %2709 = vtanh.f32 %v1797_v11 }
0x139c   :  { %v2708_v12 = vpop.eup %2707 }
0x139d   :  { %v1802_v13 = vadd.f32 1.0, %v2708_v12 }
0x139e   :  { %v2710_v14 = vpop.eup %2709 }
0x139f   :  { %v1801_v16 = vadd.f32 1.0, %v2710_v14  ;;  %v1804_v17 = vmul.f32 0.5, %v1802_v13 }
0x13a1   :  { %v1803_v19 = vmul.f32 0.5, %v1801_v16  ;;  %v1806_v21 = vmul.f32 %v1804_v17, %v1786_v58  ;;  %v2042_v58 = vld [vmem:[#allocation2 + $0x250] sm:$0xff]  ;;  %v2149_v17 = vld [vmem:[#allocation2 + $0x288] sm:$0xff] }
0x13a3   :  { %v1805_v20 = vmul.f32 %v1803_v19, %v1781_v0  ;;  %v2039_v0 = vld [vmem:[#allocation2 + $0x238] sm:$0xff]  ;;  %v2148_v19 = vld [vmem:[#allocation2 + $0x280] sm:$0xff] }
0x13a5   :  { %2602 = vmatprep.mubr.msk.f32.mxu0 %vm52_vm0, %v1805_v20  ;;  %v2127_v20 = vld [vmem:[#allocation2 + $0x278] sm:$0x1] }
0x13a6   :  { %2603 = vmatmul.mubr.msk.f32.vlgmr.msra.gmra.mxu0 %vm52_vm0, %v1806_v21  ;;  %v2128_v21 = vadd.f32 1e-05, %v2127_v20 }
0x13a7   :  { %2631 = vmatprep.mubr.msk.f32.mxu0 %vm2775_vm5, %v2767_v18  ;;  %2628 = vmatpush3.msra.mxu0 %v2149_v17 }
0x13a8   :  { %2629 = vmatprep.subr.mxu0 %v2767_v18 }
0x13a9   :  { %2630 = vmatpush3.msra.mxu0 %v2148_v19 }
0x1466   :  { %v2604_v23 = vpop.f32.mrf.mxu0 }
0x1467   :  { %v1898_v24 = vadd.f32 %v2604_v23, %v2301_v22 }
0x1468   :  { %v1892_v25 = vpop.f32.mrf.mxu0 }
0x1469   :  { %v1893_v26 = vadd.f32 %v2301_v22, %v1892_v25  ;;  %v1902_v27 = vadd.f32 %v1898_v24, %v1698_v46  ;;  %v2304_v46 = vld [vmem:[#allocation2 + $0x200] ss:$0 sm:$0xff]  ;;  %v2131_v22 = vshrl.u32 %v30_v15, 7  ;;  %v2308_v25 = vld [vmem:[#allocation2 + $0x258] ss:$0 sm:$0xff] }
0x146b   :  { %v1908_v28 = vsel %vm136_vm3, %v1902_v27, 0.0  ;;  %v1901_v29 = vadd.f32 %v1893_v26, %v2987_v44  ;;  %v2132_v23 = vsub.s32 0, %v2131_v22 }
0x146c   :  { %1909 = vadd.xlane.f32.xlu1 %v1908_v28 }
0x146d   :  { %v1905_v30 = vsel %vm136_vm3, %v1901_v29, 0.0 }
0x146e   :  { %1906 = vadd.xlane.f32.xlu0 %v1905_v30 }
0x14f5   :  { %v1910_v31 = vpop.xlane.xlu1 %1909 }
0x14f6   :  { %v1912_v62 = vmul.f32 0.03125, %v1910_v31 }
0x14f7   :  { %v1907_v60 = vpop.xlane.xlu0 %1906 }
0x14f8   :  { %v1914_v61 = vsub.f32 %v1902_v27, %v1912_v62  ;;  %v1911_v8 = vmul.f32 0.03125, %v1907_v60  ;;  %v2310_v27 = vld [vmem:[#allocation2 + $0x270] ss:$0 sm:$0xff]  ;;  %v2311_v62 = vld [vmem:[#allocation2 + $0x260] ss:$0 sm:$0xff] }
0x14fa   :  { %v1913_v9 = vsub.f32 %v1901_v29, %v1911_v8  ;;  %v1916_v32 = vmul.f32 %v1914_v61, %v1914_v61 }
0x14fc   :  { %v1920_v56 = vsel %vm136_vm3, %v1916_v32, 0.0  ;;  %v1915_v33 = vmul.f32 %v1913_v9, %v1913_v9  ;;  %v2313_v32 = vld [vmem:[#allocation2 + $0x290] ss:$0 sm:$0xff] }
0x14fd   :  { %1921 = vadd.xlane.f32.xlu1 %v1920_v56 }
0x14fe   :  { %v1917_v34 = vsel %vm136_vm3, %v1915_v33, 0.0 }
0x14ff   :  { %1918 = vadd.xlane.f32.xlu0 %v1917_v34 }
0x1586   :  { %v1922_v39 = vpop.xlane.xlu1 %1921 }
0x1587   :  { %v1924_v40 = vmul.f32 0.03125, %v1922_v39 }
0x1588   :  { %v1919_v41 = vpop.xlane.xlu0 %1918 }
0x1589   :  { %v1926_v42 = vadd.f32 1e-07, %v1924_v40  ;;  %v1923_v43 = vmul.f32 0.03125, %v1919_v41 }
0x158b   :  { %2711 = vrsqrt.f32 %v1926_v42  ;;  %v1925_v44 = vadd.f32 1e-07, %v1923_v43 }
0x158d   :  { %2713 = vrsqrt.f32 %v1925_v44 }
0x1598   :  { %v2712_v45 = vpop.eup %2711 }
0x1599   :  { %v1930_v47 = vmul.f32 %v2712_v45, %v1914_v61  ;;  %v2312_v61 = vld [vmem:[#allocation2 + $0x268] ss:$0 sm:$0xff] }
0x159a   :  { %v2714_v48 = vpop.eup %2713 }
0x159b   :  { %v1929_v50 = vmul.f32 %v2714_v48, %v1913_v9  ;;  %v1936_v51 = vmul.f32 %v2304_v46, %v1930_v47 }
0x159d   :  { %v1935_v52 = vmul.f32 %v2304_v46, %v1929_v50  ;;  %v1942_v53 = vadd.f32 %v2305_v49, %v1936_v51 }
0x159f   :  { %v1941_v54 = vadd.f32 %v2305_v49, %v1935_v52  ;;  %v1944_v55 = vrot.slane %v1942_v53, 7 }
0x15a1   :  { %v1947_v57 = vsel %vm1946_vm6, %v1941_v54, %v1944_v55 }
0x15a2   :  { %2614 = vmatmul.mubr.msk.f32.vlgmr.msra.gmra.mxu1 %vm136_vm3, %v1947_v57 }
0x15a3   :  { %2624 = vmatprep.mubr.msk.f32.mxu1 %vm2775_vm5, %v2767_v18  ;;  %2617 = vmatpush3.msra.mxu1 %v2042_v58 }
0x15a4   :  { %2618 = vmatprep.subr.mxu1 %v2767_v18 }
0x15a5   :  { %2619 = vmatpush3.msra.mxu1 %v2041_v59 }
0x15a6   :  { %2620 = vmatprep.subr.mxu1 %v2767_v18 }
0x15a7   :  { %2621 = vmatpush3.msra.mxu1 %v2040_v63 }
0x15a8   :  { %2622 = vmatprep.subr.mxu1 %v2767_v18 }
0x15a9   :  { %2623 = vmatpush3.msra.mxu1 %v2039_v0 }
0x1662   :  { %v2026_v4 = vpop.f32.mrf.mxu1 }
0x1663   :  { %v2027_v5 = vadd.f32 %v2306_v3, %v2026_v4 }
0x1664   :  { %v2615_v6 = vpop.f32.mrf.mxu1 }
0x1665   :  { %v2030_v7 = vmul.f32 %v2027_v5, %v2027_v5 }
0x1667   :  { %v2031_v1 = vmul.f32 %v2030_v7, %v2027_v5 }
0x1669   :  { %v2032_v2 = vmul.f32 0.044715, %v2031_v1 }
0x166b   :  { %v2033_v10 = vadd.f32 %v2032_v2, %v2027_v5 }
0x166d   :  { %v2034_v11 = vmul.f32 0.7978846, %v2033_v10 }
0x166f   :  { %2715 = vtanh.f32 %v2034_v11 }
0x1670   :  { %2717 = vrsqrt.f32 %v2128_v21 }
0x167c   :  { %v2716_v12 = vpop.eup %2715 }
0x167d   :  { %v2036_v13 = vadd.f32 1.0, %v2716_v12  ;;  %v2718_v24 = vpop.eup %2717 }
0x167e   :  { %v2133_v29 = vrot.slane %v2718_v24, %v2132_v23 }
0x167f   :  { %v2037_v14 = vmul.f32 0.5, %v2036_v13 }
0x1681   :  { %v2038_v16 = vmul.f32 %v2037_v14, %v2027_v5 }
0x1683   :  { %2625 = vmatmul.mubr.msk.f32.vlgmr.msra.gmra.mxu1 %vm136_vm3, %v2038_v16 }
0x1743   :  { %v2117_v26 = vpop.f32.mrf.mxu1 }
0x1744   :  { %v2118_v28 = vadd.f32 %v2308_v25, %v2117_v26 }
0x1745   :  { %v2626_v30 = vpop.f32.mrf.mxu1 }
0x1746   :  { %v2126_v31 = vsub.f32 %v2118_v28, %v2310_v27 }
0x1748   :  { %v2134_v60 = vmul.f32 %v2133_v29, %v2126_v31 }
0x174a   :  { %v2140_v18 = vmul.f32 %v2311_v62, %v2134_v60 }
0x174c   :  { %v2146_v8 = vadd.f32 %v2312_v61, %v2140_v18 }
0x174e   :  { %v2147_v9 = vmax.f32 %v2146_v8, 0.0 }
0x1750   :  { %2632 = vmatmul.mubr.msk.f32.vlgmr.msra.gmra.mxu0 %vm290_vm4, %v2147_v9 }
0x1810   :  { %v2224_v15 = vpop.f32.mrf.mxu0 }
0x1811   :  { %v2225_v56 = vadd.f32 %v2313_v32, %v2224_v15 }
0x1812   :  { %v2633_v33 = vpop.f32.mrf.mxu0 }
0x1813   :  { %2228 = vst [vmem:[#allocation5] sm:$0x3] %v2225_v56 }
0x1814   :  { %2750 = shalt.err (!%p2747_p9)
}
0x1815   :  { %2238 = dma.vmem_to_hbm [thread:$0]  %s2236_s25, 32, %s3023_s2, [#allocation4]  }
0x1816   :  { %2761 = dma.done.wait [#allocation4], 32  }
0x1817   :  { %2762 = vsyncadd [#allocation4], 4294967264 }
0x1818   :  { %2242 = vsyncpa [#allocation3], 1 }
0x1819   :  { %2243 = vsyncpa [#allocation4], 1 }

</bundles_post_ra>
